<compile_context>
chip_gen: v5e
topology: v5e:2x2
jax: 0.10.0
libtpu: 0.0.40
codegen_flags: <defaults>
</compile_context>

<pallas_src>
import functools

import jax
import jax.numpy as jnp
from jax import lax
from jax.experimental import pallas as pl
from jax.experimental.pallas import tpu as pltpu


# --------------------------------------------------------------------------
# Kernel 1: fused K|V projection over the source features (per batch / M-tile)
# --------------------------------------------------------------------------
def _kv_proj_kernel(src_ref, wkv_ref, bkv_ref, kv_ref):
    kv = (jnp.dot(wkv_ref[...], src_ref[...], preferred_element_type=jnp.float32)
          + bkv_ref[...])
    kv_ref[...] = kv.astype(kv_ref.dtype)


# --------------------------------------------------------------------------
# Kernel 2: Q proj + per-head attention (+fused merge) + MLP (per batch/N-tile)
# --------------------------------------------------------------------------
def _attn_prop_kernel(x_ref, kv_ref,
                      wq_ref, bq_ref, wm_ref, bm_ref,
                      w1x_ref, w1m_ref, b1_ref, w2_ref, b2_ref,
                      o_ref, *, num_heads):
    f32 = jnp.float32
    bf16 = jnp.bfloat16

    x = x_ref[...]          # (D, Nt)  bf16
    kv = kv_ref[...]        # (2D, M)  bf16, rows [0:D]=K, [D:2D]=V (head-contiguous)
    D, Nt = x.shape
    M = kv.shape[1]
    dh = D // num_heads

    # ---- Q projection (1/sqrt(dh) pre-folded into wq/bq) --------------------
    q_all = (jnp.dot(wq_ref[...], x, preferred_element_type=f32)
             + bq_ref[...]).astype(bf16)                      # (D, Nt)

    ones_m = jnp.ones((1, M), bf16)                           # row-sum helper

    # ---- per-head attention with the merge conv fused into the loop ---------
    acc = jnp.zeros((D, Nt), f32)                             # merged message acc
    for h in range(num_heads):
        qh = q_all[h * dh:(h + 1) * dh, :]                    # (dh, Nt)
        kh = kv[h * dh:(h + 1) * dh, :]                       # (dh, M)
        vh = kv[D + h * dh:D + (h + 1) * dh, :]               # (dh, M)

        # scores (Nt, M): contract the dh axes directly (no transposes).
        s = lax.dot_general(qh, kh, (((0,), (0,)), ((), ())),
                            preferred_element_type=f32)
        s = s - jnp.max(s, axis=-1, keepdims=True)
        p = jnp.exp(s).astype(bf16)                           # un-normalized probs

        # un-normalized weighted sum (dh, Nt): contract the M axes.
        oh = lax.dot_general(vh, p, (((1,), (1,)), ((), ())),
                             preferred_element_type=f32)
        # row-sum directly in lane orientation (1, Nt) via a ones-row matmul.
        denom = lax.dot_general(ones_m, p, (((1,), (1,)), ((), ())),
                                preferred_element_type=f32)
        oh = (oh * pl.reciprocal(denom, approx=True)).astype(bf16)

        # fused merge conv: accumulate this head's contribution.
        acc = acc + jnp.dot(wm_ref[h], oh, preferred_element_type=f32)

    message = (acc + bm_ref[...]).astype(bf16)                # (D, Nt)

    # ---- fused MLP([2D, 2D, D]) on cat([x, message]); BN folded into conv1 --
    h1 = (jnp.dot(w1x_ref[...], x, preferred_element_type=f32)
          + jnp.dot(w1m_ref[...], message, preferred_element_type=f32)
          + b1_ref[...])
    h1 = jnp.maximum(h1, 0.0).astype(bf16)
    out = jnp.dot(w2_ref[...], h1, preferred_element_type=f32) + b2_ref[...]
    o_ref[...] = out.astype(o_ref.dtype)


# --------------------------------------------------------------------------
# Wrapper
# --------------------------------------------------------------------------
def _vmem_limit_bytes(default=64 << 20):
    """~75% of physical VMEM, capped at 100 MiB (v5e/v6e: ~96 MiB, v7x: ~48 MiB)."""
    try:
        cap = int(pltpu.get_tpu_info().vmem_capacity_bytes)
        return min(100 << 20, (cap * 3) // 4)
    except Exception:
        return default


def attentional_propagation(x, source, prep, *, num_heads,
                            block_n=512, block_m=512):
    """x: (B, D, N), source: (B, D, M) -> (B, D, N) (same as the PyTorch module)."""
    B, D, N = x.shape
    M = source.shape[2]
    H = num_heads
    dh = D // H

    bn = min(block_n, N)
    if bn < N:
        assert bn % 128 == 0 and N % bn == 0, \
            "block_n must be a multiple of 128 that divides N"
    bm = min(block_m, M)
    if bm < M:
        assert bm % 128 == 0 and M % bm == 0, \
            "block_m must be a multiple of 128 that divides M"

    vmem_limit = _vmem_limit_bytes()
    x_bf = x.astype(jnp.bfloat16)
    src_bf = source.astype(jnp.bfloat16)

    full2 = lambda b, n: (0, 0)
    full3 = lambda b, n: (0, 0, 0)

    # ---- stage 1: K|V projection, once per batch (not per N tile) -----------
    kv = pl.pallas_call(
        _kv_proj_kernel,
        out_shape=jax.ShapeDtypeStruct((B, 2 * D, M), jnp.bfloat16),
        grid=(B, M // bm),
        in_specs=[
            pl.BlockSpec((None, D, bm), lambda b, m: (b, 0, m)),   # source tile
            pl.BlockSpec((2 * D, D), lambda b, m: (0, 0)),         # wkv
            pl.BlockSpec((2 * D, 1), lambda b, m: (0, 0)),         # bkv
        ],
        out_specs=pl.BlockSpec((None, 2 * D, bm), lambda b, m: (b, 0, m)),
        compiler_params=pltpu.CompilerParams(
            dimension_semantics=("parallel", "parallel"),
            vmem_limit_bytes=vmem_limit),
    )(src_bf, prep['wkv'], prep['bkv'])

    # ---- stage 2: fused Q/attention/merge/MLP --------------------------------
    kernel = functools.partial(_attn_prop_kernel, num_heads=num_heads)
    return pl.pallas_call(
        kernel,
        out_shape=jax.ShapeDtypeStruct((B, D, N), jnp.float32),
        grid=(B, N // bn),
        in_specs=[
            pl.BlockSpec((None, D, bn), lambda b, n: (b, 0, n)),     # x tile
            pl.BlockSpec((None, 2 * D, M), lambda b, n: (b, 0, 0)),  # kv (full M)
            pl.BlockSpec((D, D), full2),          # wq  (scale-folded, head-permuted)
            pl.BlockSpec((D, 1), full2),          # bq  (scale-folded, head-permuted)
            pl.BlockSpec((H, D, dh), full3),      # wm per head: (H, D, dh)
            pl.BlockSpec((D, 1), full2),          # bm
            pl.BlockSpec((2 * D, D), full2),      # w1x (BN-folded, x half)
            pl.BlockSpec((2 * D, D), full2),      # w1m (BN-folded, message half)
            pl.BlockSpec((2 * D, 1), full2),      # b1  (BN-folded)
            pl.BlockSpec((D, 2 * D), full2),      # w2
            pl.BlockSpec((D, 1), full2),          # b2
        ],
        out_specs=pl.BlockSpec((None, D, bn), lambda b, n: (b, 0, n)),
        compiler_params=pltpu.CompilerParams(
            dimension_semantics=("parallel", "parallel"),
            vmem_limit_bytes=vmem_limit),
    )(x_bf, kv,
      prep['wq'], prep['bq'], prep['wm_heads'], prep['bm'],
      prep['w1x'], prep['w1m'], prep['b1'], prep['w2'], prep['b2'])


# --------------------------------------------------------------------------
# Parameter initialization (deterministic, synthetic) and kernel-side prep
# --------------------------------------------------------------------------
def init_conv(key, cout, cin, zero_bias=False):
    kw, kb = jax.random.split(key)
    bound = 1.0 / (cin ** 0.5)
    w = jax.random.uniform(kw, (cout, cin), jnp.float32, -bound, bound)
    if zero_bias:
        b = jnp.zeros((cout,), jnp.float32)
    else:
        b = jax.random.uniform(kb, (cout,), jnp.float32, -bound, bound)
    return w, b


def init_bn(key, c):
    # eval-mode BatchNorm expressed as per-channel scale/shift
    k1, k2, k3 = jax.random.split(key, 3)
    gamma = 1.0 + 0.1 * jax.random.normal(k1, (c,), jnp.float32)
    beta = 0.1 * jax.random.normal(k2, (c,), jnp.float32)
    mean = 0.1 * jax.random.normal(k3, (c,), jnp.float32)
    var = jnp.ones((c,), jnp.float32)
    scale = gamma / jnp.sqrt(var + 1e-5)
    shift = beta - mean * scale
    return scale, shift


def init_attentional_propagation(key, d_model):
    ks = jax.random.split(key, 7)
    wq, bq = init_conv(ks[0], d_model, d_model)
    wk, bk = init_conv(ks[1], d_model, d_model)
    wv, bv = init_conv(ks[2], d_model, d_model)
    wm, bm = init_conv(ks[3], d_model, d_model)
    w1, b1 = init_conv(ks[4], 2 * d_model, 2 * d_model)
    bn_scale, bn_shift = init_bn(ks[5], 2 * d_model)
    w2, b2 = init_conv(ks[6], d_model, 2 * d_model, zero_bias=True)  # constant_(bias, 0)
    return dict(wq=wq, bq=bq, wk=wk, bk=bk, wv=wv, bv=bv, wm=wm, bm=bm,
                w1=w1, b1=b1, bn_scale=bn_scale, bn_shift=bn_shift,
                w2=w2, b2=b2)


def prepare_params(raw, num_heads):
    """Head-permute, fold 1/sqrt(dh) into Q, concat K|V, split merge per head,
    fold eval-mode BN into conv1, split conv1 into x/message halves, cast to bf16."""
    D = raw['wq'].shape[0]
    dh = D // num_heads
    bf16, f32 = jnp.bfloat16, jnp.float32

    # new row i = h*dh + d  <-  torch channel c = d*num_heads + h
    i = jnp.arange(D)
    old = (i % dh) * num_heads + (i // dh)

    inv_sqrt_dh = 1.0 / (dh ** 0.5)
    wq = raw['wq'][old, :] * inv_sqrt_dh          # fold attention scale into Q
    bq = raw['bq'][old] * inv_sqrt_dh
    wk, bk = raw['wk'][old, :], raw['bk'][old]
    wv, bv = raw['wv'][old, :], raw['bv'][old]

    # merge conv eats head-contiguous channels; pre-split per head -> (H, D, dh)
    wm_perm = raw['wm'][:, old]
    wm_heads = wm_perm.reshape(D, num_heads, dh).transpose(1, 0, 2)

    s, sh = raw['bn_scale'], raw['bn_shift']
    w1 = raw['w1'] * s[:, None]                   # fold eval-mode BN into conv1
    b1 = raw['b1'] * s + sh

    return dict(
        wq=wq.astype(bf16), bq=bq.reshape(D, 1).astype(f32),
        wkv=jnp.concatenate([wk, wv], axis=0).astype(bf16),
        bkv=jnp.concatenate([bk, bv], axis=0).reshape(2 * D, 1).astype(f32),
        wm_heads=wm_heads.astype(bf16), bm=raw['bm'].reshape(D, 1).astype(f32),
        w1x=w1[:, :D].astype(bf16), w1m=w1[:, D:].astype(bf16),
        b1=b1.reshape(2 * D, 1).astype(f32),
        w2=raw['w2'].astype(bf16), b2=raw['b2'].reshape(D, 1).astype(f32),
    )


# --------------------------------------------------------------------------
# Pure-JAX reference (mirrors the PyTorch module exactly, f32)
# --------------------------------------------------------------------------
def _conv1x1_ref(x, w, b):
    return jnp.einsum('oi,bil->bol', w, x) + b[None, :, None]


def attentional_propagation_ref(raw, x, source, num_heads):
    B, D, N = x.shape
    dh = D // num_heads
    q = _conv1x1_ref(x, raw['wq'], raw['bq'])
    k = _conv1x1_ref(source, raw['wk'], raw['bk'])
    v = _conv1x1_ref(source, raw['wv'], raw['bv'])

    def split(t):  # torch .view(B, dim, heads, -1)
        return t.reshape(B, dh, num_heads, t.shape[-1])

    qh, kh, vh = split(q), split(k), split(v)
    scores = jnp.einsum('bdhn,bdhm->bhnm', qh, kh) / (dh ** 0.5)
    prob = jax.nn.softmax(scores, axis=-1)
    out = jnp.einsum('bhnm,bdhm->bdhn', prob, vh)
    message = _conv1x1_ref(out.reshape(B, D, -1), raw['wm'], raw['bm'])

    cat = jnp.concatenate([x, message], axis=1)
    h = _conv1x1_ref(cat, raw['w1'], raw['b1'])
    h = h * raw['bn_scale'][None, :, None] + raw['bn_shift'][None, :, None]
    h = jnp.maximum(h, 0.0)
    return _conv1x1_ref(h, raw['w2'], raw['b2'])


# --------------------------------------------------------------------------
if __name__ == "__main__":
    # Small but representative: dh = 16 (bf16 sublane-aligned head slices),
    # N tiled into two lane-dense 128-wide blocks.
    D, H = 64, 4            # feature_dim, num_heads (D % H == 0, dh = 16)
    B, N, M = 2, 256, 128   # batch, x length, source length

    key = jax.random.PRNGKey(0)
    kp, kx, ks = jax.random.split(key, 3)
    raw = init_attentional_propagation(kp, D)
    prep = prepare_params(raw, H)

    x = jax.random.normal(kx, (B, D, N), jnp.float32)
    source = jax.random.normal(ks, (B, D, M), jnp.float32)

    fwd = jax.jit(functools.partial(attentional_propagation,
                                    num_heads=H, block_n=128, block_m=128))
    out = jax.block_until_ready(fwd(x, source, prep))

    ref = attentional_propagation_ref(raw, x, source, H)
    assert out.shape == (B, D, N) and out.dtype == jnp.float32
    assert bool(jnp.all(jnp.isfinite(out)))
    max_err = float(jnp.max(jnp.abs(out - ref)))
    assert max_err < 5e-2, f"max abs error vs reference: {max_err}"
    print("KERNEL_OK")
</pallas_src>

<mosaic_0001>
module attributes {stable_mosaic.version = 11 : i64} {
  func.func @_kv_proj_kernel(%arg0: i32, %arg1: i32, %arg2: memref<1x64x128xbf16, #tpu.memory_space<vmem>>, %arg3: memref<128x64xbf16, #tpu.memory_space<vmem>>, %arg4: memref<128x1xf32, #tpu.memory_space<vmem>>, %arg5: memref<1x128x128xbf16, #tpu.memory_space<vmem>>) attributes {dimension_semantics = [#tpu.dimension_semantics<parallel>, #tpu.dimension_semantics<parallel>], iteration_bounds = array<i64: 2, 1>, scalar_prefetch = 0 : i64, scratch_operands = 0 : i64, tpu.core_type = #tpu.core_type<tc>, window_params = [{transform_indices = @transform_0, window_bounds = array<i64: 1, 64, 128>}, {pipeline_mode = #tpu.pipeline_mode<synchronous>, transform_indices = @transform_1, window_bounds = array<i64: 128, 64>}, {pipeline_mode = #tpu.pipeline_mode<synchronous>, transform_indices = @transform_2, window_bounds = array<i64: 128, 1>}, {transform_indices = @transform_3, window_bounds = array<i64: 1, 128, 128>}]} {
    %c0 = arith.constant 0 : index
    %c0_0 = arith.constant 0 : index
    %0 = vector.load %arg3[%c0, %c0_0] : memref<128x64xbf16, #tpu.memory_space<vmem>>, vector<128x64xbf16>
    %c0_1 = arith.constant 0 : index
    %c0_2 = arith.constant 0 : index
    %c0_3 = arith.constant 0 : index
    %1 = vector.load %arg2[%c0_1, %c0_2, %c0_3] : memref<1x64x128xbf16, #tpu.memory_space<vmem>>, vector<1x64x128xbf16>
    %2 = vector.shape_cast %1 : vector<1x64x128xbf16> to vector<64x128xbf16>
    %cst = arith.constant dense<0.000000e+00> : vector<128x128xf32>
    %3 = tpu.matmul %0, %2, %cst {dimension_numbers = #tpu.dot_dimension_numbers<[1], [0], [0], [1], [0, 0, 1, 1], [], []>} : vector<128x64xbf16>, vector<64x128xbf16>, vector<128x128xf32> -> vector<128x128xf32>
    %c0_4 = arith.constant 0 : index
    %c0_5 = arith.constant 0 : index
    %4 = vector.load %arg4[%c0_4, %c0_5] : memref<128x1xf32, #tpu.memory_space<vmem>>, vector<128x1xf32>
    %5 = vector.broadcast %4 : vector<128x1xf32> to vector<128x128xf32>
    %6 = arith.addf %3, %5 : vector<128x128xf32>
    %7 = arith.truncf %6 : vector<128x128xf32> to vector<128x128xbf16>
    %c0_6 = arith.constant 0 : index
    %c0_7 = arith.constant 0 : index
    %c0_8 = arith.constant 0 : index
    %8 = vector.load %arg5[%c0_6, %c0_7, %c0_8] : memref<1x128x128xbf16, #tpu.memory_space<vmem>>, vector<1x128x128xbf16>
    %9 = vector.shape_cast %8 : vector<1x128x128xbf16> to vector<128x128xbf16>
    %10 = vector.shape_cast %7 : vector<128x128xbf16> to vector<1x128x128xbf16>
    tpu.vector_store %arg5[%c0_6, %c0_7, %c0_8], %10 {strides = array<i32>} : memref<1x128x128xbf16, #tpu.memory_space<vmem>>, vector<1x128x128xbf16>,
    return
  }
  func.func @transform_0(%arg0: i32, %arg1: i32) -> (i32, i32, i32) {
    %c0_i32 = arith.constant 0 : i32
    %c0_i32_0 = arith.constant 0 : i32
    return %arg0, %c0_i32, %arg1 : i32, i32, i32
  }
  func.func @transform_1(%arg0: i32, %arg1: i32) -> (i32, i32) {
    %c0_i32 = arith.constant 0 : i32
    %c0_i32_0 = arith.constant 0 : i32
    %c0_i32_1 = arith.constant 0 : i32
    return %c0_i32, %c0_i32_0 : i32, i32
  }
  func.func @transform_2(%arg0: i32, %arg1: i32) -> (i32, i32) {
    %c0_i32 = arith.constant 0 : i32
    %c0_i32_0 = arith.constant 0 : i32
    %c0_i32_1 = arith.constant 0 : i32
    return %c0_i32, %c0_i32_0 : i32, i32
  }
  func.func @transform_3(%arg0: i32, %arg1: i32) -> (i32, i32, i32) {
    %c0_i32 = arith.constant 0 : i32
    %c0_i32_0 = arith.constant 0 : i32
    return %arg0, %c0_i32, %arg1 : i32, i32, i32
  }
}

module attributes {stable_mosaic.version = 11 : i64} {
  func.func @_attn_prop_kernel(%arg0: i32, %arg1: i32, %arg2: memref<1x64x128xbf16, #tpu.memory_space<vmem>>, %arg3: memref<1x128x128xbf16, #tpu.memory_space<vmem>>, %arg4: memref<64x64xbf16, #tpu.memory_space<vmem>>, %arg5: memref<64x1xf32, #tpu.memory_space<vmem>>, %arg6: memref<4x64x16xbf16, #tpu.memory_space<vmem>>, %arg7: memref<64x1xf32, #tpu.memory_space<vmem>>, %arg8: memref<128x64xbf16, #tpu.memory_space<vmem>>, %arg9: memref<128x64xbf16, #tpu.memory_space<vmem>>, %arg10: memref<128x1xf32, #tpu.memory_space<vmem>>, %arg11: memref<64x128xbf16, #tpu.memory_space<vmem>>, %arg12: memref<64x1xf32, #tpu.memory_space<vmem>>, %arg13: memref<1x64x128xf32, #tpu.memory_space<vmem>>) attributes {dimension_semantics = [#tpu.dimension_semantics<parallel>, #tpu.dimension_semantics<parallel>], iteration_bounds = array<i64: 2, 2>, scalar_prefetch = 0 : i64, scratch_operands = 0 : i64, tpu.core_type = #tpu.core_type<tc>, window_params = [{transform_indices = @transform_0, window_bounds = array<i64: 1, 64, 128>}, {transform_indices = @transform_1, window_bounds = array<i64: 1, 128, 128>}, {pipeline_mode = #tpu.pipeline_mode<synchronous>, transform_indices = @transform_2, window_bounds = array<i64: 64, 64>}, {pipeline_mode = #tpu.pipeline_mode<synchronous>, transform_indices = @transform_3, window_bounds = array<i64: 64, 1>}, {pipeline_mode = #tpu.pipeline_mode<synchronous>, transform_indices = @transform_4, window_bounds = array<i64: 4, 64, 16>}, {pipeline_mode = #tpu.pipeline_mode<synchronous>, transform_indices = @transform_5, window_bounds = array<i64: 64, 1>}, {pipeline_mode = #tpu.pipeline_mode<synchronous>, transform_indices = @transform_6, window_bounds = array<i64: 128, 64>}, {pipeline_mode = #tpu.pipeline_mode<synchronous>, transform_indices = @transform_7, window_bounds = array<i64: 128, 64>}, {pipeline_mode = #tpu.pipeline_mode<synchronous>, transform_indices = @transform_8, window_bounds = array<i64: 128, 1>}, {pipeline_mode = #tpu.pipeline_mode<synchronous>, transform_indices = @transform_9, window_bounds = array<i64: 64, 128>}, {pipeline_mode = #tpu.pipeline_mode<synchronous>, transform_indices = @transform_10, window_bounds = array<i64: 64, 1>}, {transform_indices = @transform_11, window_bounds = array<i64: 1, 64, 128>}]} {
    %c0 = arith.constant 0 : index
    %c0_0 = arith.constant 0 : index
    %c0_1 = arith.constant 0 : index
    %0 = vector.load %arg2[%c0, %c0_0, %c0_1] : memref<1x64x128xbf16, #tpu.memory_space<vmem>>, vector<1x64x128xbf16>
    %1 = vector.shape_cast %0 : vector<1x64x128xbf16> to vector<64x128xbf16>
    %c0_2 = arith.constant 0 : index
    %c0_3 = arith.constant 0 : index
    %c0_4 = arith.constant 0 : index
    %2 = vector.load %arg3[%c0_2, %c0_3, %c0_4] : memref<1x128x128xbf16, #tpu.memory_space<vmem>>, vector<1x128x128xbf16>
    %3 = vector.shape_cast %2 : vector<1x128x128xbf16> to vector<128x128xbf16>
    %c0_5 = arith.constant 0 : index
    %c0_6 = arith.constant 0 : index
    %4 = vector.load %arg4[%c0_5, %c0_6] : memref<64x64xbf16, #tpu.memory_space<vmem>>, vector<64x64xbf16>
    %cst = arith.constant dense<0.000000e+00> : vector<64x128xf32>
    %5 = tpu.matmul %4, %1, %cst {dimension_numbers = #tpu.dot_dimension_numbers<[1], [0], [0], [1], [0, 0, 1, 1], [], []>} : vector<64x64xbf16>, vector<64x128xbf16>, vector<64x128xf32> -> vector<64x128xf32>
    %c0_7 = arith.constant 0 : index
    %c0_8 = arith.constant 0 : index
    %6 = vector.load %arg5[%c0_7, %c0_8] : memref<64x1xf32, #tpu.memory_space<vmem>>, vector<64x1xf32>
    %7 = vector.broadcast %6 : vector<64x1xf32> to vector<64x128xf32>
    %8 = arith.addf %5, %7 : vector<64x128xf32>
    %9 = arith.truncf %8 : vector<64x128xf32> to vector<64x128xbf16>
    %cst_9 = arith.constant 1.000000e+00 : bf16
    %10 = vector.broadcast %cst_9 : bf16 to vector<1x128xbf16>
    %cst_10 = arith.constant 0.000000e+00 : f32
    %11 = vector.broadcast %cst_10 : f32 to vector<64x128xf32>
    %12 = vector.extract_strided_slice %9 {offsets = [0, 0], sizes = [16, 128], strides = [1, 1]} : vector<64x128xbf16> to vector<16x128xbf16>
    %13 = vector.extract_strided_slice %3 {offsets = [0, 0], sizes = [16, 128], strides = [1, 1]} : vector<128x128xbf16> to vector<16x128xbf16>
    %14 = vector.extract_strided_slice %3 {offsets = [64, 0], sizes = [16, 128], strides = [1, 1]} : vector<128x128xbf16> to vector<16x128xbf16>
    %cst_11 = arith.constant dense<0.000000e+00> : vector<128x128xf32>
    %15 = tpu.matmul %12, %13, %cst_11 {dimension_numbers = #tpu.dot_dimension_numbers<[0], [0], [1], [1], [0, 1, 1, 1], [], []>} : vector<16x128xbf16>, vector<16x128xbf16>, vector<128x128xf32> -> vector<128x128xf32>
    %cst_12 = arith.constant dense<0xFF800000> : vector<128xf32>
    %16 = vector.multi_reduction <maximumf>, %15, %cst_12 [1] : vector<128x128xf32> to vector<128xf32>
    %17 = vector.shape_cast %16 : vector<128xf32> to vector<128x1xf32>
    %18 = vector.broadcast %17 : vector<128x1xf32> to vector<128x128xf32>
    %19 = arith.subf %15, %18 : vector<128x128xf32>
    %20 = math.exp %19 : vector<128x128xf32>
    %21 = arith.truncf %20 : vector<128x128xf32> to vector<128x128xbf16>
    %cst_13 = arith.constant dense<0.000000e+00> : vector<16x128xf32>
    %22 = tpu.matmul %14, %21, %cst_13 {dimension_numbers = #tpu.dot_dimension_numbers<[1], [1], [0], [0], [0, 0, 1, 0], [], []>} : vector<16x128xbf16>, vector<128x128xbf16>, vector<16x128xf32> -> vector<16x128xf32>
    %cst_14 = arith.constant dense<0.000000e+00> : vector<1x128xf32>
    %23 = tpu.matmul %10, %21, %cst_14 {dimension_numbers = #tpu.dot_dimension_numbers<[1], [1], [0], [0], [0, 0, 1, 0], [], []>} : vector<1x128xbf16>, vector<128x128xbf16>, vector<1x128xf32> -> vector<1x128xf32>
    %24 = tpu.reciprocal %23 {approx = true} : vector<1x128xf32> -> vector<1x128xf32>
    %25 = vector.broadcast %24 : vector<1x128xf32> to vector<16x128xf32>
    %26 = arith.mulf %22, %25 : vector<16x128xf32>
    %27 = arith.truncf %26 : vector<16x128xf32> to vector<16x128xbf16>
    %c0_15 = arith.constant 0 : index
    %c0_16 = arith.constant 0 : index
    %c0_17 = arith.constant 0 : index
    %28 = vector.load %arg6[%c0_15, %c0_16, %c0_17] : memref<4x64x16xbf16, #tpu.memory_space<vmem>>, vector<1x64x16xbf16>
    %29 = vector.shape_cast %28 : vector<1x64x16xbf16> to vector<64x16xbf16>
    %cst_18 = arith.constant dense<0.000000e+00> : vector<64x128xf32>
    %30 = tpu.matmul %29, %27, %cst_18 {dimension_numbers = #tpu.dot_dimension_numbers<[1], [0], [0], [1], [0, 0, 1, 1], [], []>} : vector<64x16xbf16>, vector<16x128xbf16>, vector<64x128xf32> -> vector<64x128xf32>
    %31 = arith.addf %11, %30 : vector<64x128xf32>
    %32 = vector.extract_strided_slice %9 {offsets = [16, 0], sizes = [16, 128], strides = [1, 1]} : vector<64x128xbf16> to vector<16x128xbf16>
    %33 = vector.extract_strided_slice %3 {offsets = [16, 0], sizes = [16, 128], strides = [1, 1]} : vector<128x128xbf16> to vector<16x128xbf16>
    %34 = vector.extract_strided_slice %3 {offsets = [80, 0], sizes = [16, 128], strides = [1, 1]} : vector<128x128xbf16> to vector<16x128xbf16>
    %cst_19 = arith.constant dense<0.000000e+00> : vector<128x128xf32>
    %35 = tpu.matmul %32, %33, %cst_19 {dimension_numbers = #tpu.dot_dimension_numbers<[0], [0], [1], [1], [0, 1, 1, 1], [], []>} : vector<16x128xbf16>, vector<16x128xbf16>, vector<128x128xf32> -> vector<128x128xf32>
    %cst_20 = arith.constant dense<0xFF800000> : vector<128xf32>
    %36 = vector.multi_reduction <maximumf>, %35, %cst_20 [1] : vector<128x128xf32> to vector<128xf32>
    %37 = vector.shape_cast %36 : vector<128xf32> to vector<128x1xf32>
    %38 = vector.broadcast %37 : vector<128x1xf32> to vector<128x128xf32>
    %39 = arith.subf %35, %38 : vector<128x128xf32>
    %40 = math.exp %39 : vector<128x128xf32>
    %41 = arith.truncf %40 : vector<128x128xf32> to vector<128x128xbf16>
    %cst_21 = arith.constant dense<0.000000e+00> : vector<16x128xf32>
    %42 = tpu.matmul %34, %41, %cst_21 {dimension_numbers = #tpu.dot_dimension_numbers<[1], [1], [0], [0], [0, 0, 1, 0], [], []>} : vector<16x128xbf16>, vector<128x128xbf16>, vector<16x128xf32> -> vector<16x128xf32>
    %cst_22 = arith.constant dense<0.000000e+00> : vector<1x128xf32>
    %43 = tpu.matmul %10, %41, %cst_22 {dimension_numbers = #tpu.dot_dimension_numbers<[1], [1], [0], [0], [0, 0, 1, 0], [], []>} : vector<1x128xbf16>, vector<128x128xbf16>, vector<1x128xf32> -> vector<1x128xf32>
    %44 = tpu.reciprocal %43 {approx = true} : vector<1x128xf32> -> vector<1x128xf32>
    %45 = vector.broadcast %44 : vector<1x128xf32> to vector<16x128xf32>
    %46 = arith.mulf %42, %45 : vector<16x128xf32>
    %47 = arith.truncf %46 : vector<16x128xf32> to vector<16x128xbf16>
    %c1 = arith.constant 1 : index
    %c0_23 = arith.constant 0 : index
    %c0_24 = arith.constant 0 : index
    %48 = vector.load %arg6[%c1, %c0_23, %c0_24] : memref<4x64x16xbf16, #tpu.memory_space<vmem>>, vector<1x64x16xbf16>
    %49 = vector.shape_cast %48 : vector<1x64x16xbf16> to vector<64x16xbf16>
    %cst_25 = arith.constant dense<0.000000e+00> : vector<64x128xf32>
    %50 = tpu.matmul %49, %47, %cst_25 {dimension_numbers = #tpu.dot_dimension_numbers<[1], [0], [0], [1], [0, 0, 1, 1], [], []>} : vector<64x16xbf16>, vector<16x128xbf16>, vector<64x128xf32> -> vector<64x128xf32>
    %51 = arith.addf %31, %50 : vector<64x128xf32>
    %52 = vector.extract_strided_slice %9 {offsets = [32, 0], sizes = [16, 128], strides = [1, 1]} : vector<64x128xbf16> to vector<16x128xbf16>
    %53 = vector.extract_strided_slice %3 {offsets = [32, 0], sizes = [16, 128], strides = [1, 1]} : vector<128x128xbf16> to vector<16x128xbf16>
    %54 = vector.extract_strided_slice %3 {offsets = [96, 0], sizes = [16, 128], strides = [1, 1]} : vector<128x128xbf16> to vector<16x128xbf16>
    %cst_26 = arith.constant dense<0.000000e+00> : vector<128x128xf32>
    %55 = tpu.matmul %52, %53, %cst_26 {dimension_numbers = #tpu.dot_dimension_numbers<[0], [0], [1], [1], [0, 1, 1, 1], [], []>} : vector<16x128xbf16>, vector<16x128xbf16>, vector<128x128xf32> -> vector<128x128xf32>
    %cst_27 = arith.constant dense<0xFF800000> : vector<128xf32>
    %56 = vector.multi_reduction <maximumf>, %55, %cst_27 [1] : vector<128x128xf32> to vector<128xf32>
    %57 = vector.shape_cast %56 : vector<128xf32> to vector<128x1xf32>
    %58 = vector.broadcast %57 : vector<128x1xf32> to vector<128x128xf32>
    %59 = arith.subf %55, %58 : vector<128x128xf32>
    %60 = math.exp %59 : vector<128x128xf32>
    %61 = arith.truncf %60 : vector<128x128xf32> to vector<128x128xbf16>
    %cst_28 = arith.constant dense<0.000000e+00> : vector<16x128xf32>
    %62 = tpu.matmul %54, %61, %cst_28 {dimension_numbers = #tpu.dot_dimension_numbers<[1], [1], [0], [0], [0, 0, 1, 0], [], []>} : vector<16x128xbf16>, vector<128x128xbf16>, vector<16x128xf32> -> vector<16x128xf32>
    %cst_29 = arith.constant dense<0.000000e+00> : vector<1x128xf32>
    %63 = tpu.matmul %10, %61, %cst_29 {dimension_numbers = #tpu.dot_dimension_numbers<[1], [1], [0], [0], [0, 0, 1, 0], [], []>} : vector<1x128xbf16>, vector<128x128xbf16>, vector<1x128xf32> -> vector<1x128xf32>
    %64 = tpu.reciprocal %63 {approx = true} : vector<1x128xf32> -> vector<1x128xf32>
    %65 = vector.broadcast %64 : vector<1x128xf32> to vector<16x128xf32>
    %66 = arith.mulf %62, %65 : vector<16x128xf32>
    %67 = arith.truncf %66 : vector<16x128xf32> to vector<16x128xbf16>
    %c2 = arith.constant 2 : index
    %c0_30 = arith.constant 0 : index
    %c0_31 = arith.constant 0 : index
    %68 = vector.load %arg6[%c2, %c0_30, %c0_31] : memref<4x64x16xbf16, #tpu.memory_space<vmem>>, vector<1x64x16xbf16>
    %69 = vector.shape_cast %68 : vector<1x64x16xbf16> to vector<64x16xbf16>
    %cst_32 = arith.constant dense<0.000000e+00> : vector<64x128xf32>
    %70 = tpu.matmul %69, %67, %cst_32 {dimension_numbers = #tpu.dot_dimension_numbers<[1], [0], [0], [1], [0, 0, 1, 1], [], []>} : vector<64x16xbf16>, vector<16x128xbf16>, vector<64x128xf32> -> vector<64x128xf32>
    %71 = arith.addf %51, %70 : vector<64x128xf32>
    %72 = vector.extract_strided_slice %9 {offsets = [48, 0], sizes = [16, 128], strides = [1, 1]} : vector<64x128xbf16> to vector<16x128xbf16>
    %73 = vector.extract_strided_slice %3 {offsets = [48, 0], sizes = [16, 128], strides = [1, 1]} : vector<128x128xbf16> to vector<16x128xbf16>
    %74 = vector.extract_strided_slice %3 {offsets = [112, 0], sizes = [16, 128], strides = [1, 1]} : vector<128x128xbf16> to vector<16x128xbf16>
    %cst_33 = arith.constant dense<0.000000e+00> : vector<128x128xf32>
    %75 = tpu.matmul %72, %73, %cst_33 {dimension_numbers = #tpu.dot_dimension_numbers<[0], [0], [1], [1], [0, 1, 1, 1], [], []>} : vector<16x128xbf16>, vector<16x128xbf16>, vector<128x128xf32> -> vector<128x128xf32>
    %cst_34 = arith.constant dense<0xFF800000> : vector<128xf32>
    %76 = vector.multi_reduction <maximumf>, %75, %cst_34 [1] : vector<128x128xf32> to vector<128xf32>
    %77 = vector.shape_cast %76 : vector<128xf32> to vector<128x1xf32>
    %78 = vector.broadcast %77 : vector<128x1xf32> to vector<128x128xf32>
    %79 = arith.subf %75, %78 : vector<128x128xf32>
    %80 = math.exp %79 : vector<128x128xf32>
    %81 = arith.truncf %80 : vector<128x128xf32> to vector<128x128xbf16>
    %cst_35 = arith.constant dense<0.000000e+00> : vector<16x128xf32>
    %82 = tpu.matmul %74, %81, %cst_35 {dimension_numbers = #tpu.dot_dimension_numbers<[1], [1], [0], [0], [0, 0, 1, 0], [], []>} : vector<16x128xbf16>, vector<128x128xbf16>, vector<16x128xf32> -> vector<16x128xf32>
    %cst_36 = arith.constant dense<0.000000e+00> : vector<1x128xf32>
    %83 = tpu.matmul %10, %81, %cst_36 {dimension_numbers = #tpu.dot_dimension_numbers<[1], [1], [0], [0], [0, 0, 1, 0], [], []>} : vector<1x128xbf16>, vector<128x128xbf16>, vector<1x128xf32> -> vector<1x128xf32>
    %84 = tpu.reciprocal %83 {approx = true} : vector<1x128xf32> -> vector<1x128xf32>
    %85 = vector.broadcast %84 : vector<1x128xf32> to vector<16x128xf32>
    %86 = arith.mulf %82, %85 : vector<16x128xf32>
    %87 = arith.truncf %86 : vector<16x128xf32> to vector<16x128xbf16>
    %c3 = arith.constant 3 : index
    %c0_37 = arith.constant 0 : index
    %c0_38 = arith.constant 0 : index
    %88 = vector.load %arg6[%c3, %c0_37, %c0_38] : memref<4x64x16xbf16, #tpu.memory_space<vmem>>, vector<1x64x16xbf16>
    %89 = vector.shape_cast %88 : vector<1x64x16xbf16> to vector<64x16xbf16>
    %cst_39 = arith.constant dense<0.000000e+00> : vector<64x128xf32>
    %90 = tpu.matmul %89, %87, %cst_39 {dimension_numbers = #tpu.dot_dimension_numbers<[1], [0], [0], [1], [0, 0, 1, 1], [], []>} : vector<64x16xbf16>, vector<16x128xbf16>, vector<64x128xf32> -> vector<64x128xf32>
    %91 = arith.addf %71, %90 : vector<64x128xf32>
    %c0_40 = arith.constant 0 : index
    %c0_41 = arith.constant 0 : index
    %92 = vector.load %arg7[%c0_40, %c0_41] : memref<64x1xf32, #tpu.memory_space<vmem>>, vector<64x1xf32>
    %93 = vector.broadcast %92 : vector<64x1xf32> to vector<64x128xf32>
    %94 = arith.addf %91, %93 : vector<64x128xf32>
    %95 = arith.truncf %94 : vector<64x128xf32> to vector<64x128xbf16>
    %c0_42 = arith.constant 0 : index
    %c0_43 = arith.constant 0 : index
    %96 = vector.load %arg8[%c0_42, %c0_43] : memref<128x64xbf16, #tpu.memory_space<vmem>>, vector<128x64xbf16>
    %cst_44 = arith.constant dense<0.000000e+00> : vector<128x128xf32>
    %97 = tpu.matmul %96, %1, %cst_44 {dimension_numbers = #tpu.dot_dimension_numbers<[1], [0], [0], [1], [0, 0, 1, 1], [], []>} : vector<128x64xbf16>, vector<64x128xbf16>, vector<128x128xf32> -> vector<128x128xf32>
    %c0_45 = arith.constant 0 : index
    %c0_46 = arith.constant 0 : index
    %98 = vector.load %arg9[%c0_45, %c0_46] : memref<128x64xbf16, #tpu.memory_space<vmem>>, vector<128x64xbf16>
    %cst_47 = arith.constant dense<0.000000e+00> : vector<128x128xf32>
    %99 = tpu.matmul %98, %95, %cst_47 {dimension_numbers = #tpu.dot_dimension_numbers<[1], [0], [0], [1], [0, 0, 1, 1], [], []>} : vector<128x64xbf16>, vector<64x128xbf16>, vector<128x128xf32> -> vector<128x128xf32>
    %100 = arith.addf %97, %99 : vector<128x128xf32>
    %c0_48 = arith.constant 0 : index
    %c0_49 = arith.constant 0 : index
    %101 = vector.load %arg10[%c0_48, %c0_49] : memref<128x1xf32, #tpu.memory_space<vmem>>, vector<128x1xf32>
    %102 = vector.broadcast %101 : vector<128x1xf32> to vector<128x128xf32>
    %103 = arith.addf %100, %102 : vector<128x128xf32>
    %cst_50 = arith.constant 0.000000e+00 : f32
    %104 = vector.broadcast %cst_50 : f32 to vector<128x128xf32>
    %105 = arith.maximumf %103, %104 : vector<128x128xf32>
    %106 = arith.truncf %105 : vector<128x128xf32> to vector<128x128xbf16>
    %c0_51 = arith.constant 0 : index
    %c0_52 = arith.constant 0 : index
    %107 = vector.load %arg11[%c0_51, %c0_52] : memref<64x128xbf16, #tpu.memory_space<vmem>>, vector<64x128xbf16>
    %cst_53 = arith.constant dense<0.000000e+00> : vector<64x128xf32>
    %108 = tpu.matmul %107, %106, %cst_53 {dimension_numbers = #tpu.dot_dimension_numbers<[1], [0], [0], [1], [0, 0, 1, 1], [], []>} : vector<64x128xbf16>, vector<128x128xbf16>, vector<64x128xf32> -> vector<64x128xf32>
    %c0_54 = arith.constant 0 : index
    %c0_55 = arith.constant 0 : index
    %109 = vector.load %arg12[%c0_54, %c0_55] : memref<64x1xf32, #tpu.memory_space<vmem>>, vector<64x1xf32>
    %110 = vector.broadcast %109 : vector<64x1xf32> to vector<64x128xf32>
    %111 = arith.addf %108, %110 : vector<64x128xf32>
    %c0_56 = arith.constant 0 : index
    %c0_57 = arith.constant 0 : index
    %c0_58 = arith.constant 0 : index
    %112 = vector.load %arg13[%c0_56, %c0_57, %c0_58] : memref<1x64x128xf32, #tpu.memory_space<vmem>>, vector<1x64x128xf32>
    %113 = vector.shape_cast %112 : vector<1x64x128xf32> to vector<64x128xf32>
    %114 = vector.shape_cast %111 : vector<64x128xf32> to vector<1x64x128xf32>
    tpu.vector_store %arg13[%c0_56, %c0_57, %c0_58], %114 {strides = array<i32>} : memref<1x64x128xf32, #tpu.memory_space<vmem>>, vector<1x64x128xf32>,
    return
  }
  func.func @transform_0(%arg0: i32, %arg1: i32) -> (i32, i32, i32) {
    %c0_i32 = arith.constant 0 : i32
    %c0_i32_0 = arith.constant 0 : i32
    return %arg0, %c0_i32, %arg1 : i32, i32, i32
  }
  func.func @transform_1(%arg0: i32, %arg1: i32) -> (i32, i32, i32) {
    %c0_i32 = arith.constant 0 : i32
    %c0_i32_0 = arith.constant 0 : i32
    %c0_i32_1 = arith.constant 0 : i32
    return %arg0, %c0_i32, %c0_i32_0 : i32, i32, i32
  }
  func.func @transform_2(%arg0: i32, %arg1: i32) -> (i32, i32) {
    %c0_i32 = arith.constant 0 : i32
    %c0_i32_0 = arith.constant 0 : i32
    %c0_i32_1 = arith.constant 0 : i32
    return %c0_i32, %c0_i32_0 : i32, i32
  }
  func.func @transform_3(%arg0: i32, %arg1: i32) -> (i32, i32) {
    %c0_i32 = arith.constant 0 : i32
    %c0_i32_0 = arith.constant 0 : i32
    %c0_i32_1 = arith.constant 0 : i32
    return %c0_i32, %c0_i32_0 : i32, i32
  }
  func.func @transform_4(%arg0: i32, %arg1: i32) -> (i32, i32, i32) {
    %c0_i32 = arith.constant 0 : i32
    %c0_i32_0 = arith.constant 0 : i32
    %c0_i32_1 = arith.constant 0 : i32
    %c0_i32_2 = arith.constant 0 : i32
    return %c0_i32, %c0_i32_0, %c0_i32_1 : i32, i32, i32
  }
  func.func @transform_5(%arg0: i32, %arg1: i32) -> (i32, i32) {
    %c0_i32 = arith.constant 0 : i32
    %c0_i32_0 = arith.constant 0 : i32
    %c0_i32_1 = arith.constant 0 : i32
    return %c0_i32, %c0_i32_0 : i32, i32
  }
  func.func @transform_6(%arg0: i32, %arg1: i32) -> (i32, i32) {
    %c0_i32 = arith.constant 0 : i32
    %c0_i32_0 = arith.constant 0 : i32
    %c0_i32_1 = arith.constant 0 : i32
    return %c0_i32, %c0_i32_0 : i32, i32
  }
  func.func @transform_7(%arg0: i32, %arg1: i32) -> (i32, i32) {
    %c0_i32 = arith.constant 0 : i32
    %c0_i32_0 = arith.constant 0 : i32
    %c0_i32_1 = arith.constant 0 : i32
    return %c0_i32, %c0_i32_0 : i32, i32
  }
  func.func @transform_8(%arg0: i32, %arg1: i32) -> (i32, i32) {
    %c0_i32 = arith.constant 0 : i32
    %c0_i32_0 = arith.constant 0 : i32
    %c0_i32_1 = arith.constant 0 : i32
    return %c0_i32, %c0_i32_0 : i32, i32
  }
  func.func @transform_9(%arg0: i32, %arg1: i32) -> (i32, i32) {
    %c0_i32 = arith.constant 0 : i32
    %c0_i32_0 = arith.constant 0 : i32
    %c0_i32_1 = arith.constant 0 : i32
    return %c0_i32, %c0_i32_0 : i32, i32
  }
  func.func @transform_10(%arg0: i32, %arg1: i32) -> (i32, i32) {
    %c0_i32 = arith.constant 0 : i32
    %c0_i32_0 = arith.constant 0 : i32
    %c0_i32_1 = arith.constant 0 : i32
    return %c0_i32, %c0_i32_0 : i32, i32
  }
  func.func @transform_11(%arg0: i32, %arg1: i32) -> (i32, i32, i32) {
    %c0_i32 = arith.constant 0 : i32
    %c0_i32_0 = arith.constant 0 : i32
    return %arg0, %c0_i32, %arg1 : i32, i32, i32
  }
}

</mosaic_0001>

<bundles_post_ra>
// kernel: attentional_propagation.2
= control target key start
LH: loop header
LB: loop body
LE: loop exit
PB: predicated region body
PF: predicated region fallthrough
CT: control target
= control target key end

     0   :  { %s789_s12 = smov 0   ;;  %s791_s13 = smov 0   ;;  %s916_s0 = inlined_call_operand.vmem [shape: bf16[2,64,128], index: 0, kind: input, shape index: {}]   ;;  %s917_s1 = inlined_call_operand.vmem [shape: bf16[128,64], index: 1, kind: input, shape index: {}]   ;;  %s918_s2 = inlined_call_operand.vmem [shape: f32[128,1], index: 2, kind: input, shape index: {}]   ;;  %s919_s3 = inlined_call_operand.vmem [shape: bf16[2,128,128], index: 3, kind: output, shape index: {}]  }
   0x1   :  { %s793_s14 = smov 0  }
   0x2 LB: > { %s25_s15 = sadd.s32 1, %s762_s13  ;;  %p580_p0 = scmp.ge.s32.totalorder %s766_s14, 1  ;;  %s766_s14 = sphi %s793_s14, %s13_s14   ;;  %s762_s13 = sphi %s791_s13, %s921_s13   ;;  %s758_s12 = sphi %s789_s12, %s920_s12  }
   0x3   : > { %p27_p1 = scmp.ge.s32.totalorder %s25_s15, 2  ;;  %p156_p2 = scmp.lt.s32.totalorder %s766_s14, 3 }
   0x5   : > { %s923_s15 = smov (%p27_p1, %s25_s15), 0  ;;  %p157_p3 = pnand %p580_p0, %p156_p2 }
   0x6   : > { %p186_p4 = scmp.lt.s32.totalorder (!%p157_p3), %s758_s12, 1 }
   0x7   : > { %160 = sbr.rel (%p157_p3) target bundleno = 195 (0xc3), region = 32 }
   0xc   : > { %v229_v0 = vld [vmem:[%s918_s2 + $0x10] sm:$0xff]  ;;  %v227_v1 = vld [vmem:[%s918_s2] sm:$0xff]  ;;  %v768_v2 = vmov 0   ;;  %s925_s12 = smov (!%p186_p4, %s758_s12), 1  ;;  %v230_v5 = vld [vmem:[%s918_s2 + $0x18] sm:$0xff]  ;;  %vm387_vm0 = vcmask 523264  }
   0xd   : > { %742 = vset.pattern.permute.xlu1 %v768_v2  ;;  %741 = vset.pattern.permute.xlu0 %v768_v2  ;;  %v231_v3 = vld [vmem:[%s918_s2 + $0x20] sm:$0xff]  ;;  %s643_s22 = sshll.u32 %s925_s12, 5  ;;  %v228_v6 = vld [vmem:[%s918_s2 + $0x8] sm:$0xff]  ;;  %v234_v10 = vld [vmem:[%s918_s2 + $0x38] sm:$0xff] }
   0xe   : > { %255 = vperm.xlu1 %742, %v229_v0   ;;  %245 = vperm.xlu0 %741, %v227_v1   ;;  %s193_s25 = scalar_lea.vmem %s916_s0, %s643_s22  ;;  %v232_v8 = vld [vmem:[%s918_s2 + $0x28] sm:$0xff]  ;;  %v233_v11 = vld [vmem:[%s918_s2 + $0x30] sm:$0xff]  ;;  %v645_v13 = vld [vmem:[%s917_s1] sm:$0xff]  ;;  %s644_s22 = sshll.u32 %s925_s12, 6 }
   0xf   : > { %743 = vset.pattern.permute.xlu2 %v768_v2  ;;  %v656_v4 = vld [vmem:[%s193_s25 + $0x18] sm:$0xff]  ;;  %v655_v7 = vld [vmem:[%s193_s25 + $0x10] sm:$0xff]  ;;  %v654_v9 = vld [vmem:[%s193_s25 + $0x8] sm:$0xff] }
  0x10   : > { %265 = vperm.xlu2 %743, %v231_v3   ;;  %416 = vmatpush.bf16.msra.mxu0 %v656_v4  ;;  %v653_v12 = vld [vmem:[%s193_s25] sm:$0xff]  ;;  %v647_v14 = vld [vmem:[%s917_s1 + $0x10] sm:$0xff]  ;;  %v236_v19 = vld [vmem:[%s918_s2 + $0x48] sm:$0xff]  ;;  %s897_s25 = scalar_lea.vmem %s919_s3, %s644_s22 }
  0x11   : > { %704 = vmatpush.bf16.msra.mxu1 %v656_v4  ;;  %705 = vmatpush.bf16.msra.mxu2 %v656_v4  ;;  %v235_v15 = vld [vmem:[%s918_s2 + $0x40] sm:$0xff]  ;;  %v651_v17 = vld [vmem:[%s917_s1 + $0x30] sm:$0xff]  ;;  %v238_v20 = vld [vmem:[%s918_s2 + $0x58] sm:$0xff] }
  0x12   : > { %706 = vmatpush.bf16.msra.mxu3 %v656_v4  ;;  %v649_v16 = vld [vmem:[%s917_s1 + $0x20] sm:$0xff]  ;;  %v237_v18 = vld [vmem:[%s918_s2 + $0x50] sm:$0xff]  ;;  %v240_v21 = vld [vmem:[%s918_s2 + $0x68] sm:$0xff] }
  0x13   : > { %v239_v22 = vld [vmem:[%s918_s2 + $0x60] sm:$0xff]  ;;  %v646_v23 = vld [vmem:[%s917_s1 + $0x8] sm:$0xff]  ;;  %v648_v24 = vld [vmem:[%s917_s1 + $0x18] sm:$0xff] }
  0x14   : > { %417 = vmatpush.bf16.msra.mxu0 %v655_v7  ;;  %v241_v25 = vld [vmem:[%s918_s2 + $0x70] sm:$0xff]  ;;  %v650_v26 = vld [vmem:[%s917_s1 + $0x28] sm:$0xff]  ;;  %v652_v27 = vld [vmem:[%s917_s1 + $0x38] sm:$0xff] }
  0x15   : > { %707 = vmatpush.bf16.msra.mxu1 %v655_v7  ;;  %708 = vmatpush.bf16.msra.mxu2 %v655_v7  ;;  %v242_v28 = vld [vmem:[%s918_s2 + $0x78] sm:$0xff] }
  0x16   : > { %260 = vperm.xlu1 %742, %v230_v5   ;;  %250 = vperm.xlu0 %741, %v228_v6  }
  0x17   : > { %709 = vmatpush.bf16.msra.mxu3 %v655_v7 }
  0x18   : > { %270 = vperm.xlu2 %743, %v232_v8   ;;  %418 = vmatpush.bf16.msra.mxu0 %v654_v9 }
  0x19   : > { %710 = vmatpush.bf16.msra.mxu1 %v654_v9  ;;  %711 = vmatpush.bf16.msra.mxu2 %v654_v9 }
  0x1b   : > { %712 = vmatpush.bf16.msra.mxu3 %v654_v9 }
  0x1c   : > { %419 = vmatpush.bf16.msra.mxu0 %v653_v12 }
  0x1d   : > { %713 = vmatpush.bf16.msra.mxu1 %v653_v12  ;;  %714 = vmatpush.bf16.msra.mxu2 %v653_v12 }
  0x1e   : > { %280 = vperm.xlu1 %742, %v234_v10   ;;  %275 = vperm.xlu0 %741, %v233_v11  }
  0x1f   : > { %715 = vmatpush.bf16.msra.mxu3 %v653_v12  ;;  %633 = vmatmul.msk.bf16.vlgmr.msra.gmra.mxu0 %vm387_vm0, %v645_v13 }
  0x20   : > { %285 = vperm.xlu2 %743, %v235_v15   ;;  %635 = vmatmul.msk.bf16.vlgmr.msra.gmra.mxu1 %vm387_vm0, %v647_v14 }
  0x21   : > { %637 = vmatmul.msk.bf16.vlgmr.msra.gmra.mxu2 %vm387_vm0, %v649_v16 }
  0x22   : > { %639 = vmatmul.msk.bf16.vlgmr.msra.gmra.mxu3 %vm387_vm0, %v651_v17 }
  0x26   : > { %295 = vperm.xlu1 %742, %v237_v18   ;;  %290 = vperm.xlu0 %741, %v236_v19  }
  0x28   : > { %300 = vperm.xlu2 %743, %v238_v20  }
  0x2e   : > { %310 = vperm.xlu1 %742, %v240_v21   ;;  %305 = vperm.xlu0 %741, %v239_v22  }
  0x2f   : > { %634 = vmatmul.msk.bf16.gmra.mxu0 %vm387_vm0, %v646_v23 }
  0x30   : > { %315 = vperm.xlu2 %743, %v241_v25   ;;  %636 = vmatmul.msk.bf16.gmra.mxu1 %vm387_vm0, %v648_v24 }
  0x31   : > { %638 = vmatmul.msk.bf16.gmra.mxu2 %vm387_vm0, %v650_v26 }
  0x32   : > { %640 = vmatmul.msk.bf16.gmra.mxu3 %vm387_vm0, %v652_v27 }
  0x36   : > { %320 = vperm.xlu0 %741, %v242_v28  }
  0x6a   : > { %v266_v33 = vpop.permute.xlu2 %265 }
  0x72   : > { %v271_v36 = vpop.permute.xlu2 %270 }
  0x7a   : > { %v286_v45 = vpop.permute.xlu2 %285 }
  0x80   : > { %v256_v29 = vpop.permute.xlu1 %255  ;;  %v246_v30 = vpop.permute.xlu0 %245 }
  0x82   : > { %v301_v0 = vpop.permute.xlu2 %300 }
  0x88   : > { %v261_v31 = vpop.permute.xlu1 %260  ;;  %v251_v32 = vpop.permute.xlu0 %250 }
  0x8a   : > { %v316_v11 = vpop.permute.xlu2 %315 }
  0x90   : > { %v281_v34 = vpop.permute.xlu1 %280  ;;  %v276_v35 = vpop.permute.xlu0 %275 }
  0x98   : > { %v296_v39 = vpop.permute.xlu1 %295  ;;  %v291_v40 = vpop.permute.xlu0 %290 }
  0x9c   : > { %v421_v37 = vpop.f32.mrf.mxu0 }
  0x9d   : > { %v431_v38 = vpop.f32.mrf.mxu1  ;;  %v422_v46 = vadd.f32 %v421_v37, %v246_v30 }
  0x9e   : > { %v432_v47 = vadd.f32 %v431_v38, %v266_v33 }
  0xa0   : > { %v311_v52 = vpop.permute.xlu1 %310  ;;  %v306_v53 = vpop.permute.xlu0 %305 }
  0xa4   : > { %v441_v41 = vpop.f32.mrf.mxu2  ;;  %v423_v43 = vpop.f32.mrf.mxu0 }
  0xa5   : > { %v451_v42 = vpop.f32.mrf.mxu3  ;;  %v433_v44 = vpop.f32.mrf.mxu1  ;;  %v424_v48 = vadd.f32 %v423_v43, %v251_v32  ;;  %v442_v56 = vadd.f32 %v441_v41, %v286_v45 }
  0xa6   : > { %v434_v49 = vadd.f32 %v433_v44, %v271_v36  ;;  %v452_v57 = vadd.f32 %v451_v42, %v306_v53 }
  0xa7   : > { %v660_v50 = vpack.c.bf16 %v424_v48, %v422_v46 }
  0xa8   : > { %v670_v51 = vpack.c.bf16 %v434_v49, %v432_v47  ;;  %v321_v12 = vpop.permute.xlu0 %320 }
  0xa9   : > { %661 = vst [vmem:[%s897_s25] sm:$0xff] %v660_v50  }
  0xaa   : > { %698 = vst [vmem:[%s897_s25 + $0x10] sm:$0xff] %v670_v51  }
  0xac   : > { %v443_v54 = vpop.f32.mrf.mxu2  ;;  %v426_v60 = vpop.f32.mrf.mxu0 }
  0xad   : > { %v453_v55 = vpop.f32.mrf.mxu3  ;;  %v444_v58 = vadd.f32 %v443_v54, %v291_v40  ;;  %v436_v61 = vpop.f32.mrf.mxu1  ;;  %v427_v5 = vadd.f32 %v426_v60, %v256_v29 }
  0xae   : > { %v454_v59 = vadd.f32 %v453_v55, %v311_v52  ;;  %v437_v6 = vadd.f32 %v436_v61, %v276_v35 }
  0xaf   : > { %v680_v62 = vpack.c.bf16 %v444_v58, %v442_v56 }
  0xb0   : > { %v690_v63 = vpack.c.bf16 %v454_v59, %v452_v57 }
  0xb1   : > { %700 = vst [vmem:[%s897_s25 + $0x20] sm:$0xff] %v680_v62  }
  0xb2   : > { %702 = vst [vmem:[%s897_s25 + $0x30] sm:$0xff] %v690_v63  }
  0xb4   : > { %v446_v1 = vpop.f32.mrf.mxu2  ;;  %v428_v3 = vpop.f32.mrf.mxu0 }
  0xb5   : > { %v456_v2 = vpop.f32.mrf.mxu3  ;;  %v438_v4 = vpop.f32.mrf.mxu1  ;;  %v429_v7 = vadd.f32 %v428_v3, %v261_v31  ;;  %v447_v15 = vadd.f32 %v446_v1, %v296_v39 }
  0xb6   : > { %v439_v8 = vadd.f32 %v438_v4, %v281_v34  ;;  %v457_v16 = vadd.f32 %v456_v2, %v316_v11 }
  0xb7   : > { %v665_v9 = vpack.c.bf16 %v429_v7, %v427_v5 }
  0xb8   : > { %v675_v10 = vpack.c.bf16 %v439_v8, %v437_v6 }
  0xb9   : > { %697 = vst [vmem:[%s897_s25 + $0x8] sm:$0xff] %v665_v9  }
  0xba   : > { %699 = vst [vmem:[%s897_s25 + $0x18] sm:$0xff] %v675_v10  }
  0xbc   : > { %v448_v13 = vpop.f32.mrf.mxu2 }
  0xbd   : > { %v458_v14 = vpop.f32.mrf.mxu3  ;;  %v449_v17 = vadd.f32 %v448_v13, %v301_v0 }
  0xbe   : > { %v459_v18 = vadd.f32 %v458_v14, %v321_v12 }
  0xbf   : > { %v685_v19 = vpack.c.bf16 %v449_v17, %v447_v15 }
  0xc0   : > { %v695_v20 = vpack.c.bf16 %v459_v18, %v457_v16 }
  0xc1   : > { %701 = vst [vmem:[%s897_s25 + $0x28] sm:$0xff] %v685_v19  }
  0xc2   : > { %703 = vst [vmem:[%s897_s25 + $0x38] sm:$0xff] %v695_v20  }
  0xc3 PF: > { %s13_s14 = sadd.s32 1, %s766_s14   ;;  %s920_s12 = smov %s762_s13 }
  0xc4   : > { %p10_p5 = scmp.ge.s32.totalorder %s13_s14, 4   ;;  %s921_s13 = smov %s923_s15 }
  0xc6   :  { %12 = sbr.rel (!%p10_p5) target bundleno = 2 (0x2), region = 62 }

// kernel: attentional_propagation.3
= control target key start
LH: loop header
LB: loop body
LE: loop exit
PB: predicated region body
PF: predicated region fallthrough
CT: control target
= control target key end

     0   :  { %s4097_s0 = inlined_call_operand.vmem [shape: bf16[2,64,256], index: 0, kind: input, shape index: {}]   ;;  %s4098_s1 = inlined_call_operand.vmem [shape: bf16[2,128,128], index: 1, kind: input, shape index: {}]   ;;  %s4099_s2 = inlined_call_operand.vmem [shape: bf16[64,64], index: 2, kind: input, shape index: {}]   ;;  %s4100_s3 = inlined_call_operand.vmem [shape: f32[64,1], index: 3, kind: input, shape index: {}]   ;;  %s4101_s4 = inlined_call_operand.vmem [shape: bf16[4,64,16], index: 4, kind: input, shape index: {}]   ;;  %s4102_s5 = inlined_call_operand.vmem [shape: f32[64,1], index: 5, kind: input, shape index: {}]   ;;  %s4103_s6 = inlined_call_operand.vmem [shape: bf16[128,64], index: 6, kind: input, shape index: {}]   ;;  %s4104_s7 = inlined_call_operand.vmem [shape: bf16[128,64], index: 7, kind: input, shape index: {}]   ;;  %s4105_s8 = inlined_call_operand.vmem [shape: f32[128,1], index: 8, kind: input, shape index: {}]   ;;  %s4106_s9 = inlined_call_operand.vmem [shape: bf16[64,128], index: 9, kind: input, shape index: {}]   ;;  %s4107_s10 = inlined_call_operand.vmem [shape: f32[64,1], index: 10, kind: input, shape index: {}]   ;;  %s4108_s11 = inlined_call_operand.hbm [shape: f32[2,64,256], index: 11, kind: output, shape index: {}]  }
   0x1   :  { %4114 = sst [smem:[#allocation10_spill]] %s4097_s0 }
   0x2   :  { %4115 = sst [smem:[#allocation11_spill]] %s4098_s1 }
   0x3   :  { %4116 = sst [smem:[#allocation12_spill]] %s4099_s2 }
   0x4   :  { %4117 = sst [smem:[#allocation13_spill]] %s4108_s11 }
   0x5   :  { %16 = vsyncpa [#allocation4], 0 }
   0x6   :  { %18 = vsyncpa [#allocation4 + $0x1], 0  ;;  %s3314_s17 = smov 0   ;;  %s3316_s18 = smov 0  }
   0x7   :  { %s3318_s19 = smov 0   ;;  %s3320_s20 = smov 0  }
   0x8   :  { %s3322_s21 = smov 0   ;;  %s3324_s22 = smov 0  }
   0x9   :  { %s3326_s23 = smov 0   ;;  %s3328_s24 = smov 0  }
   0xa LB: > { %4118 = sst [smem:[#allocation6_spill]] %s3219_s17  ;;  %s2557_s25 = sadd.s32 4294967295, %s3247_s24   ;;  %s3247_s24 = sphi %s3328_s24, %s24_s24   ;;  %s3243_s23 = sphi %s3326_s23, %s4139_s23   ;;  %s3239_s22 = sphi %s3324_s22, %s4138_s22   ;;  %s3235_s21 = sphi %s3322_s21, %s4137_s21   ;;  %s3231_s20 = sphi %s3320_s20, %s4136_s20   ;;  %s3227_s19 = sphi %s3318_s19, %s4135_s19   ;;  %s3223_s18 = sphi %s3316_s18, %s4134_s18   ;;  %s3219_s17 = sphi %s3314_s17, %s4133_s17  }
   0xb   : > { %s2558_s26 = sadd.s32 4294967294, %s3247_s24   ;;  %s33_s27 = sadd.s32 1, %s3239_s22 }
   0xc   : > { %p34_p0 = scmp.ge.s32.totalorder %s33_s27, 2  ;;  %s36_s28 = sadd.s32 1, %s3243_s23 }
   0xd   : > { %p52_p1 = scmp.ne.s32.totalorder %s3227_s19, %s3223_s18  ;;  %p53_p2 = scmp.eq.s32.totalorder %s3247_s24, 0 }
   0xe   : > { %s4141_s27 = smov (%p34_p0, %s33_s27), 0  ;;  %s4143_s28 = smov (!%p34_p0, %s36_s28), %s3243_s23 }
   0xf   : > { %4119 = sst [smem:[#allocation7_spill]] %s4141_s27  ;;  %s41_s29 = ssub.s32 %s3239_s22, %s4141_s27 }
  0x10   : > { %p3366_p3 = por %p53_p2, %p52_p1  ;;  %p38_p4 = scmp.ge.s32.totalorder %s4143_s28, 2 }
  0x11   : > { %p299_p5 = scmp.eq.s32.totalorder %s2557_s25, 3  ;;  %p304_p6 = scmp.ne.s32.totalorder %s3223_s18, %s3219_s17 }
  0x12   : > { %p305_p7 = scmp.eq.s32.totalorder %s2558_s26, 3  ;;  %s4145_s28 = smov (%p38_p4, %s4143_s28), 0 }
  0x13   : > { %4121 = sst [smem:[#allocation8_spill]] %s4145_s28  ;;  %p3374_p8 = por %p299_p5, %p52_p1 }
  0x14   : > { %p3378_p9 = por %p305_p7, %p304_p6  ;;  %s40_s14 = ssub.s32 %s3243_s23, %s4145_s28 }
  0x15   : > { %s42_s15 = sor.u32 %s41_s29, %s40_s14  ;;  %s45_s16 = sadd.s32 1, %s3227_s19 }
  0x16   : > { %s4123_s13 = scalar_select %p3378_p9, 1, 0 }
  0x17   : > { %p43_p10 = scmp.eq.s32.totalorder %s42_s15, 0  ;;  %p2560_p11 = scmp.ge.s32.totalorder %s3247_s24, 4 }
  0x18   : > { %4124 = sst [smem:[#allocation9_spill]] %s4123_s13 }
  0x19   : > { %s3386_s27 = scalar_select %p43_p10, %s3227_s19, %s45_s16  }
  0x1a   : > { %348 = sbr.rel (%p2560_p11) target bundleno = 49 (0x31), region = 52 }
  0x1f   : > { %351 = sbr.rel (!%p3366_p3) target bundleno = 49 (0x31), region = 56  ;;  %s353_s25 = sand.u32 (%p3366_p3), 1, %s3227_s19  }
  0x20   : > { %s2562_s26 = sshll.u32 (%p3366_p3), %s3243_s23, 4  ;;  %s2561_s17 = sshll.u32 (%p3366_p3), %s353_s25, 5 }
  0x21   : > { %s357_s11 = sadd.s32 (%p3366_p3), %s3239_s22, %s2562_s26  ;;  %s4125_s0 = sld [smem:[#allocation10_spill]] (%p3366_p3) }
  0x22   : > { %s2563_s13 = sshll.u32 (%p3366_p3), %s357_s11, 2  ;;  %s355_s15 = scalar_lea.vmem (%p3366_p3), [#allocation2], %s2561_s17 }
  0x27   : > { %s359_s14 = scalar_lea.vmem %s4125_s0, %s2563_s13 }
  0x28   : > { %v376_v0 = vld [vmem:[%s359_s14] sm:$0xf]  ;;  %v378_v1 = vld [vmem:[%s359_s14 + $0x8] sm:$0xf]  ;;  %v380_v2 = vld [vmem:[%s359_s14 + $0x10] sm:$0xf] }
  0x29   : > { %377 = vst [vmem:[%s355_s15] sm:$0xf] %v376_v0  ;;  %v382_v3 = vld [vmem:[%s359_s14 + $0x18] sm:$0xf]  ;;  %v384_v4 = vld [vmem:[%s359_s14 + $0x20] sm:$0xf] }
  0x2a   : > { %379 = vst [vmem:[%s355_s15 + $0x4] sm:$0xf] %v378_v1  ;;  %v386_v5 = vld [vmem:[%s359_s14 + $0x28] sm:$0xf]  ;;  %v388_v6 = vld [vmem:[%s359_s14 + $0x30] sm:$0xf] }
  0x2b   : > { %381 = vst [vmem:[%s355_s15 + $0x8] sm:$0xf] %v380_v2  ;;  %v390_v7 = vld [vmem:[%s359_s14 + $0x38] sm:$0xf] }
  0x2c   : > { %383 = vst [vmem:[%s355_s15 + $0xc] sm:$0xf] %v382_v3 }
  0x2d   : > { %385 = vst [vmem:[%s355_s15 + $0x10] sm:$0xf] %v384_v4 }
  0x2e   : > { %387 = vst [vmem:[%s355_s15 + $0x14] sm:$0xf] %v386_v5 }
  0x2f   : > { %389 = vst [vmem:[%s355_s15 + $0x18] sm:$0xf] %v388_v6 }
  0x30   : > { %391 = vst [vmem:[%s355_s15 + $0x1c] sm:$0xf] %v390_v7 }
  0x31 PF: > { %p2564_p12 = scmp.ge.s32.totalorder %s3247_s24, 1  ;;  %p438_p13 = scmp.lt.s32.totalorder %s3247_s24, 5 }
  0x33   : > { %p439_p0 = pnand %p2564_p12, %p438_p13 }
  0x34   : > { %s3400_s11 = sand.u32 (!%p439_p0), 1, %s3223_s18   ;;  %s4126_s2 = sld [smem:[#allocation12_spill]] (!%p439_p0) }
  0x35   : > { %442 = sbr.rel (%p439_p0) target bundleno = 3535 (0xdcf), region = 101  ;;  %s2565_s30 = sshll.u32 (!%p439_p0), %s3400_s11, 5 }
  0x36   : > { %s3406_s13 = scalar_lea.vmem (!%p439_p0), [#allocation2], %s2565_s30  ;;  %p489_p1 = scmp.lt.s32.totalorder (!%p439_p0), %s3235_s21, 1 }
  0x37   : > { %s4127_s1 = sld [smem:[#allocation11_spill]] (!%p439_p0)  ;;  %s2566_s16 = sshll.u32 (!%p439_p0), %s3400_s11, 6 }
  0x38   : > { %s4042_s25 = scalar_lea.vmem (!%p439_p0), [#allocation3], %s2566_s16 }
  0x39   : > { %s2459_s28 = sshll.u32 (!%p439_p0), %s4042_s25, 4  ;;  %s2460_s28 = int_to_ptr.vmem [resolvable:$true] %s2459_s28 }
  0x3a   : > { %v528_v8 = vld [vmem:[%s4100_s3] sm:$0xff]  ;;  %v3249_v9 = vmov 0   ;;  %v2878_v10 = vld [vmem:[%s3406_s13 + $0x18] sm:$0xff]  ;;  %v2877_v11 = vld [vmem:[%s3406_s13 + $0x10] sm:$0xff]  ;;  %vm620_vm0 = vcmask 523264   ;;  %s490_s14 = scalar_select %p489_p1, %s3235_s21, 1 }
  0x3b   : > { %3010 = vset.pattern.permute.xlu0 %v3249_v9  ;;  %3011 = vset.pattern.permute.xlu2 %v3249_v9  ;;  %v529_v12 = vld [vmem:[%s4100_s3 + $0x8] sm:$0xff]  ;;  %v2875_v14 = vld [vmem:[%s3406_s13] sm:$0xff]  ;;  %vm698_vm1 = vcmask 130048   ;;  %v530_v52 = vld [vmem:[%s4100_s3 + $0x10] sm:$0xff] }
  0x3c   : > { %538 = vperm.xlu0 %3010, %v528_v8   ;;  %637 = vmatpush.bf16.msra.mxu0 %v2878_v10  ;;  %v2876_v13 = vld [vmem:[%s3406_s13 + $0x8] sm:$0xff]  ;;  %v2887_v15 = vld [vmem:[%s4126_s2] sm:$0xff]  ;;  %s2874_s15 = sshll.u32 %s490_s14, 6  ;;  %v531_v54 = vld [vmem:[%s4100_s3 + $0x18] sm:$0xff] }
  0x3d   : > { %s3424_s30 = scalar_lea.vmem %s4127_s1, %s2874_s15  ;;  %v2888_v46 = vld [vmem:[%s4126_s2 + $0x8] sm:$0xff]  ;;  %s4128_s15 = sld [smem:[#allocation13_spill]] }
  0x3e   : > { %v2879_v16 = vld [vmem:[%s3424_s30] sm:$0xff] }
  0x3f   : > { %730 = vmatpush.bf16.msra.mxu1 %v2879_v16  ;;  %2927 = vmatpush.bf16.msra.mxu3 %v2879_v16 }
  0x40   : > { %638 = vmatpush.bf16.msra.mxu0 %v2877_v11 }
  0x44   : > { %543 = vperm.xlu0 %3010, %v529_v12   ;;  %639 = vmatpush.bf16.msra.mxu0 %v2876_v13 }
  0x48   : > { %640 = vmatpush.bf16.msra.mxu0 %v2875_v14 }
  0x4b   : > { %2601 = vmatmul.msk.bf16.vlgmr.msra.gmra.mxu0 %vm620_vm0, %v2887_v15 }
  0x5b   : > { %2602 = vmatmul.msk.bf16.gmra.mxu0 %vm620_vm0, %v2888_v46 }
  0xae   : > { %v539_v17 = vpop.permute.xlu0 %538 }
  0xb6   : > { %v544_v20 = vpop.permute.xlu0 %543 }
  0xc8   : > { %v642_v18 = vpop.f32.mrf.mxu0 }
  0xc9   : > { %v643_v19 = vadd.f32 %v642_v18, %v539_v17 }
  0xcb   : > { %v662_v22 = vpack.c.bf16 %v643_v19, %v643_v19 }
  0xcd   : > { %v672_v25 = vunpack.c.l.b16 %v662_v22 }
  0xd0   : > { %v644_v21 = vpop.f32.mrf.mxu0 }
  0xd1   : > { %v645_v23 = vadd.f32 %v644_v21, %v544_v20 }
  0xd3   : > { %v663_v24 = vpack.c.bf16 %v645_v23, %v645_v23 }
  0xd5   : > { %v673_v26 = vunpack.c.l.b16 %v663_v24 }
  0xd7   : > { %v674_v27 = vpack.c.b16 %v673_v26, %v672_v25 }
  0xd9   : > { %676 = vxpose.xlu1.c.b16.start.end [1/1] (short) %v674_v27, 128  ;;  %v647_v27 = vpop.f32.mrf.mxu0 }
 0x12c   : > { %3012 = vset.pattern.permute.xlu1 %v3249_v9 }
 0x185   : > { %v684_v28 = vpop.trf.xlu1 }
 0x186   : > { %2609 = vmatmul.msk.bf16.vlgmr.msra.gmra.mxu1 %vm698_vm1, %v684_v28 }
 0x195   : > { %v685_v29 = vpop.trf.xlu1 }
 0x196   : > { %2610 = vmatmul.msk.bf16.gmra.mxu1 %vm698_vm1, %v685_v29 }
 0x1a5   : > { %v686_v30 = vpop.trf.xlu1 }
 0x1a6   : > { %2611 = vmatmul.msk.bf16.gmra.mxu1 %vm698_vm1, %v686_v30 }
 0x1b5   : > { %v687_v31 = vpop.trf.xlu1 }
 0x1b6   : > { %2612 = vmatmul.msk.bf16.gmra.mxu1 %vm698_vm1, %v687_v31 }
 0x1c5   : > { %v688_v32 = vpop.trf.xlu1 }
 0x1c6   : > { %2613 = vmatmul.msk.bf16.vlgmr.msra.gmra.mxu3 %vm698_vm1, %v688_v32 }
 0x1d5   : > { %v689_v33 = vpop.trf.xlu1 }
 0x1d6   : > { %2614 = vmatmul.msk.bf16.gmra.mxu3 %vm698_vm1, %v689_v33 }
 0x1e5   : > { %v690_v34 = vpop.trf.xlu1 }
 0x1e6   : > { %2615 = vmatmul.msk.bf16.gmra.mxu3 %vm698_vm1, %v690_v34 }
 0x1f5   : > { %v691_v35 = vpop.trf.xlu1 }
 0x1f6   : > { %2616 = vmatmul.msk.bf16.gmra.mxu3 %vm698_vm1, %v691_v35 }
 0x203   : > { %v3437_v37 = vpop.f32.mrf.mxu1 }
 0x20b   : > { %v3443_v40 = vpop.f32.mrf.mxu1 }
 0x213   : > { %v3447_v42 = vpop.f32.mrf.mxu1 }
 0x21b   : > { %v3449_v44 = vpop.f32.mrf.mxu1 }
 0x223   : > { %v3456_v47 = vpop.f32.mrf.mxu1 }
 0x22b   : > { %v3462_v49 = vpop.f32.mrf.mxu1 }
 0x233   : > { %v3466_v50 = vpop.f32.mrf.mxu1 }
 0x23b   : > { %v3469_v51 = vpop.f32.mrf.mxu1 }
 0x249   : > { %v3435_v36 = vpop.f32.mrf.mxu3 }
 0x251   : > { %v3439_v38 = vpop.f32.mrf.mxu3 }
 0x259   : > { %v3441_v39 = vpop.f32.mrf.mxu3 }
 0x261   : > { %v3445_v41 = vpop.f32.mrf.mxu3 }
 0x269   : > { %v762_v43 = vpop.f32.mrf.mxu3 }
 0x26a   : > { %796 = vmax.xlane.f32.xlu2 %v762_v43 }
 0x271   : > { %v764_v45 = vpop.f32.mrf.mxu3 }
 0x272   : > { %792 = vmax.xlane.f32.xlu2 %v3441_v39  ;;  %798 = vmax.xlane.f32.xlu0 %v764_v45 }
 0x279   : > { %v767_v48 = vpop.f32.mrf.mxu3 }
 0x27a   : > { %794 = vmax.xlane.f32.xlu2 %v3445_v41  ;;  %780 = vmax.xlane.f32.xlu0 %v3456_v47 }
 0x27b   : > { %800 = vmax.xlane.f32.xlu1 %v767_v48 }
 0x281   : > { %v769_v53 = vpop.f32.mrf.mxu3 }
 0x282   : > { %788 = vmax.xlane.f32.xlu2 %v3435_v36  ;;  %776 = vmax.xlane.f32.xlu0 %v3447_v42 }
 0x28a   : > { %790 = vmax.xlane.f32.xlu2 %v3439_v38  ;;  %772 = vmax.xlane.f32.xlu0 %v3437_v37 }
 0x292   : > { %784 = vmax.xlane.f32.xlu2 %v3466_v50 }
 0x29a   : > { %786 = vmax.xlane.f32.xlu2 %v3469_v51 }
 0x29e   : > { %548 = vperm.xlu0 %3010, %v530_v52  }
 0x2a2   : > { %802 = vmax.xlane.f32.xlu2 %v769_v53 }
 0x2aa   : > { %782 = vmax.xlane.f32.xlu2 %v3462_v49 }
 0x2b2   : > { %778 = vmax.xlane.f32.xlu2 %v3449_v44 }
 0x2ba   : > { %774 = vmax.xlane.f32.xlu2 %v3443_v40 }
 0x2d2   : > { %553 = vperm.xlu2 %3011, %v531_v54  }
 0x2dd   : > { %v797_v55 = vpop.xlane.xlu2 %796 }
 0x2de   : > { %v816_v7 = vsub.f32 %v762_v43, %v797_v55 }
 0x2e0   : > { %v844_v11 = vmul.f32 1.442695, %v816_v7 }
 0x2e5   : > { %v793_v56 = vpop.xlane.xlu2 %792  ;;  %v799_v61 = vpop.xlane.xlu0 %798 }
 0x2e6   : > { %v817_v5 = vsub.f32 %v764_v45, %v799_v61  ;;  %v814_v16 = vsub.f32 %v3441_v39, %v793_v56  ;;  %v649_v39 = vpop.f32.mrf.mxu0 }
 0x2e8   : > { %v846_v8 = vmul.f32 1.442695, %v817_v5  ;;  %v840_v20 = vmul.f32 1.442695, %v814_v16  ;;  %v3250_v16 = vmov 1065369472  }
 0x2ed   : > { %v795_v57 = vpop.xlane.xlu2 %794  ;;  %v3481_v1 = vpop.xlane.xlu0 %780 }
 0x2ee   : > { %v801_v63 = vpop.xlane.xlu1 %800  ;;  %v815_v14 = vsub.f32 %v3445_v41, %v795_v57  ;;  %v808_v55 = vsub.f32 %v3456_v47, %v3481_v1  ;;  %v2889_v57 = vld [vmem:[%s4126_s2 + $0x10] sm:$0xff] }
 0x2ef   : > { %v818_v0 = vsub.f32 %v767_v48, %v801_v63  ;;  %2603 = vmatmul.msk.bf16.gmra.mxu0 %vm620_vm0, %v2889_v57 }
 0x2f0   : > { %v842_v17 = vmul.f32 1.442695, %v815_v14 }
 0x2f1   : > { %v848_v2 = vmul.f32 1.442695, %v818_v0 }
 0x2f3   : > { %3013 = vpow2.f32 %v848_v2 }
 0x2f5   : > { %v789_v58 = vpop.xlane.xlu2 %788  ;;  %v3483_v9 = vpop.xlane.xlu0 %776 }
 0x2f6   : > { %v812_v25 = vsub.f32 %v3435_v36, %v789_v58  ;;  %v806_v63 = vsub.f32 %v3447_v42, %v3483_v9 }
 0x2f8   : > { %v836_v30 = vmul.f32 1.442695, %v812_v25  ;;  %v824_v2 = vmul.f32 1.442695, %v806_v63 }
 0x2f9   : > { %v3014_v12 = vpop.eup %3013 }
 0x2fd   : > { %v791_v59 = vpop.xlane.xlu2 %790  ;;  %v3487_v21 = vpop.xlane.xlu0 %772 }
 0x2fe   : > { %v813_v23 = vsub.f32 %v3439_v38, %v791_v59 }
 0x300   : > { %v838_v26 = vmul.f32 1.442695, %v813_v23 }
 0x305   : > { %v785_v60 = vpop.xlane.xlu2 %784 }
 0x306   : > { %v810_v35 = vsub.f32 %v3466_v50, %v785_v60 }
 0x308   : > { %v832_v45 = vmul.f32 1.442695, %v810_v35 }
 0x30d   : > { %v787_v62 = vpop.xlane.xlu2 %786 }
 0x30e   : > { %v811_v33 = vsub.f32 %v3469_v51, %v787_v62 }
 0x310   : > { %v549_v31 = vpop.permute.xlu0 %548  ;;  %v834_v36 = vmul.f32 1.442695, %v811_v33 }
 0x311   : > { %v648_v38 = vadd.f32 %v647_v27, %v549_v31 }
 0x313   : > { %v664_v46 = vpack.c.bf16 %v648_v38, %v648_v38  ;;  %v532_v38 = vld [vmem:[%s4100_s3 + $0x20] sm:$0xff] }
 0x315   : > { %v803_v3 = vpop.xlane.xlu2 %802  ;;  %v908_v50 = vunpack.c.l.b16 %v664_v46 }
 0x316   : > { %v819_v4 = vsub.f32 %v769_v53, %v803_v3 }
 0x318   : > { %v850_v6 = vmul.f32 1.442695, %v819_v4 }
 0x31a   : > { %3015 = vpow2.f32 %v850_v6  ;;  %v2890_v6 = vld [vmem:[%s4126_s2 + $0x18] sm:$0xff] }
 0x31b   : > { %3017 = vpow2.f32 %v846_v8  ;;  %2604 = vmatmul.msk.bf16.gmra.mxu0 %vm620_vm0, %v2890_v6 }
 0x31c   : > { %3019 = vpow2.f32 %v844_v11 }
 0x31d   : > { %v783_v10 = vpop.xlane.xlu2 %782  ;;  %3021 = vpow2.f32 %v842_v17 }
 0x31e   : > { %3023 = vpow2.f32 %v840_v20  ;;  %v809_v53 = vsub.f32 %v3462_v49, %v783_v10  ;;  %v828_v49 = vmul.f32 1.442695, %v808_v55  ;;  %v533_v55 = vld [vmem:[%s4100_s3 + $0x28] sm:$0xff] }
 0x31f   : > { %3025 = vpow2.f32 %v838_v26 }
 0x320   : > { %v3016_v13 = vpop.eup %3015  ;;  %3027 = vpow2.f32 %v836_v30  ;;  %v830_v58 = vmul.f32 1.442695, %v809_v53 }
 0x321   : > { %v859_v15 = vpack.c.bf16 %v3016_v13, %v3014_v12  ;;  %v3018_v19 = vpop.eup %3017  ;;  %3029 = vpow2.f32 %v834_v36  ;;  %v2880_v12 = vld [vmem:[%s3424_s30 + $0x8] sm:$0xff] }
 0x322   : > { %v3020_v22 = vpop.eup %3019  ;;  %3031 = vpow2.f32 %v832_v45 }
 0x323   : > { %866 = vmatpush.bf16.xpose.msrb.mxu0 %v859_v15  ;;  %880 = vmatpush.bf16.xpose.msrb.mxu1 %v859_v15  ;;  %v858_v24 = vpack.c.bf16 %v3018_v19, %v3020_v22  ;;  %v3022_v29 = vpop.eup %3021  ;;  %3033 = vpow2.f32 %v830_v58 }
 0x324   : > { %v3024_v32 = vpop.eup %3023  ;;  %3035 = vpow2.f32 %v828_v49 }
 0x325   : > { %v779_v18 = vpop.xlane.xlu2 %778  ;;  %v857_v34 = vpack.c.bf16 %v3022_v29, %v3024_v32  ;;  %v3026_v43 = vpop.eup %3025 }
 0x326   : > { %v3028_v52 = vpop.eup %3027  ;;  %v807_v47 = vsub.f32 %v3449_v44, %v779_v18  ;;  %v804_v44 = vsub.f32 %v3437_v37, %v3487_v21  ;;  %v2883_v37 = vld [vmem:[%s3424_s30 + $0x20] sm:$0xff] }
 0x327   : > { %v856_v51 = vpack.c.bf16 %v3026_v43, %v3028_v52  ;;  %v3030_v60 = vpop.eup %3029 }
 0x328   : > { %v3032_v61 = vpop.eup %3031  ;;  %v826_v0 = vmul.f32 1.442695, %v807_v47  ;;  %v820_v8 = vmul.f32 1.442695, %v804_v44 }
 0x329   : > { %v855_v62 = vpack.c.bf16 %v3030_v60, %v3032_v61  ;;  %v3034_v1 = vpop.eup %3033 }
 0x32a   : > { %v3036_v3 = vpop.eup %3035  ;;  %3037 = vpow2.f32 %v826_v0 }
 0x32b   : > { %867 = vmatpush.bf16.xpose.msrb.mxu0 %v858_v24  ;;  %881 = vmatpush.bf16.xpose.msrb.mxu1 %v858_v24  ;;  %v854_v5 = vpack.c.bf16 %v3034_v1, %v3036_v3  ;;  %3039 = vpow2.f32 %v824_v2 }
 0x32d   : > { %v775_v28 = vpop.xlane.xlu2 %774 }
 0x32e   : > { %v805_v4 = vsub.f32 %v3443_v40, %v775_v28 }
 0x330   : > { %v822_v42 = vmul.f32 1.442695, %v805_v4  ;;  %v3038_v7 = vpop.eup %3037 }
 0x331   : > { %v3040_v9 = vpop.eup %3039 }
 0x332   : > { %3041 = vpow2.f32 %v822_v42  ;;  %v853_v40 = vpack.c.bf16 %v3038_v7, %v3040_v9 }
 0x333   : > { %868 = vmatpush.bf16.xpose.msrb.mxu0 %v857_v34  ;;  %882 = vmatpush.bf16.xpose.msrb.mxu1 %v857_v34  ;;  %3043 = vpow2.f32 %v820_v8 }
 0x335   : > { %v554_v41 = vpop.permute.xlu2 %553 }
 0x336   : > { %v650_v48 = vadd.f32 %v649_v39, %v554_v41 }
 0x338   : > { %v665_v54 = vpack.c.bf16 %v650_v48, %v650_v48  ;;  %v3042_v10 = vpop.eup %3041 }
 0x339   : > { %v3044_v11 = vpop.eup %3043 }
 0x33a   : > { %v909_v56 = vunpack.c.l.b16 %v665_v54  ;;  %v852_v13 = vpack.c.bf16 %v3042_v10, %v3044_v11 }
 0x33b   : > { %869 = vmatpush.bf16.xpose.msrb.mxu0 %v856_v51  ;;  %883 = vmatpush.bf16.xpose.msrb.mxu1 %v856_v51 }
 0x33c   : > { %v910_v59 = vpack.c.b16 %v909_v56, %v908_v50 }
 0x33e   : > { %912 = vxpose.xlu0.c.b16.start.end [1/1] (short) %v910_v59, 128 }
 0x343   : > { %870 = vmatpush.bf16.xpose.msrb.mxu0 %v855_v62  ;;  %884 = vmatpush.bf16.xpose.msrb.mxu1 %v855_v62 }
 0x34b   : > { %871 = vmatpush.bf16.xpose.msrb.mxu0 %v854_v5  ;;  %885 = vmatpush.bf16.xpose.msrb.mxu1 %v854_v5 }
 0x353   : > { %872 = vmatpush.bf16.xpose.msrb.mxu0 %v853_v40  ;;  %886 = vmatpush.bf16.xpose.msrb.mxu1 %v853_v40 }
 0x35b   : > { %873 = vmatpush.bf16.xpose.msrb.mxu0 %v852_v13  ;;  %887 = vmatpush.bf16.xpose.msrb.mxu1 %v852_v13 }
 0x362   : > { %874 = vmatmul.bf16.vlgmr.msrb.gmra.mxu0 %v2883_v37  ;;  %888 = vmatmul.bf16.vlgmr.msrb.gmra.mxu1 %v3250_v16 }
 0x363   : > { %965 = vmatpush.bf16.msra.mxu0 %v2880_v12  ;;  %2928 = vmatpush.bf16.msra.mxu1 %v2880_v12 }
 0x36c   : > { %v3518_v20 = vpop.f32.mrf.mxu0 }
 0x374   : > { %v3520_v21 = vpop.f32.mrf.mxu0 }
 0x398   : > { %v3523_v23 = vpop.f32.mrf.mxu0 }
 0x3a0   : > { %v3525_v25 = vpop.f32.mrf.mxu0 }
 0x3df   : > { %v3528_v26 = vpop.f32.mrf.mxu0  ;;  %v3540_v32 = vpop.f32.mrf.mxu1 }
 0x3e7   : > { %v3531_v28 = vpop.f32.mrf.mxu0  ;;  %v891_v34 = vpop.f32.mrf.mxu1 }
 0x3ea   : > { %v920_v14 = vpop.trf.xlu0 }
 0x3eb   : > { %2625 = vmatmul.msk.bf16.vlgmr.msra.gmra.mxu0 %vm698_vm1, %v920_v14 }
 0x3fa   : > { %v921_v15 = vpop.trf.xlu0 }
 0x3fb   : > { %2626 = vmatmul.msk.bf16.gmra.mxu0 %vm698_vm1, %v921_v15 }
 0x40a   : > { %v922_v17 = vpop.trf.xlu0 }
 0x40b   : > { %2627 = vmatmul.msk.bf16.gmra.mxu0 %vm698_vm1, %v922_v17 }
 0x41a   : > { %v923_v18 = vpop.trf.xlu0 }
 0x41b   : > { %2628 = vmatmul.msk.bf16.gmra.mxu0 %vm698_vm1, %v923_v18 }
 0x42a   : > { %v924_v19 = vpop.trf.xlu0 }
 0x42b   : > { %2629 = vmatmul.msk.bf16.gmra.mxu0 %vm698_vm1, %v924_v19 }
 0x43a   : > { %v925_v22 = vpop.trf.xlu0 }
 0x43b   : > { %2630 = vmatmul.msk.bf16.gmra.mxu0 %vm698_vm1, %v925_v22 }
 0x44a   : > { %v926_v24 = vpop.trf.xlu0 }
 0x44b   : > { %2631 = vmatmul.msk.bf16.gmra.mxu0 %vm698_vm1, %v926_v24 }
 0x45a   : > { %v927_v27 = vpop.trf.xlu0 }
 0x45b   : > { %2632 = vmatmul.msk.bf16.vlgmr.msra.gmra.mxu1 %vm698_vm1, %v927_v27 }
 0x468   : > { %v3533_v29 = vpop.f32.mrf.mxu0 }
 0x470   : > { %v3535_v30 = vpop.f32.mrf.mxu0 }
 0x478   : > { %v3537_v31 = vpop.f32.mrf.mxu0 }
 0x479   : > { %1011 = vmax.xlane.f32.xlu1 %v3537_v31 }
 0x480   : > { %v3542_v33 = vpop.f32.mrf.mxu0 }
 0x488   : > { %v3544_v35 = vpop.f32.mrf.mxu0 }
 0x489   : > { %1015 = vmax.xlane.f32.xlu1 %v3544_v35 }
 0x490   : > { %v3551_v36 = vpop.f32.mrf.mxu0 }
 0x491   : > { %1007 = vmax.xlane.f32.xlu1 %v3533_v29 }
 0x498   : > { %v982_v41 = vpop.f32.mrf.mxu0 }
 0x4a0   : > { %v984_v45 = vpop.f32.mrf.mxu0 }
 0x4a8   : > { %v3554_v46 = vpop.f32.mrf.mxu0 }
 0x4aa   : > { %558 = vperm.xlu1 %3012, %v532_v38  }
 0x4b0   : > { %v3556_v48 = vpop.f32.mrf.mxu0 }
 0x4b8   : > { %v992_v52 = vpop.f32.mrf.mxu0 }
 0x4c0   : > { %v994_v53 = vpop.f32.mrf.mxu0 }
 0x4c8   : > { %v997_v54 = vpop.f32.mrf.mxu0 }
 0x4d0   : > { %v999_v51 = vpop.f32.mrf.mxu0 }
 0x4d8   : > { %v1002_v39 = vpop.f32.mrf.mxu1 }
 0x4d9   : > { %1035 = vmax.xlane.f32.xlu2 %v1002_v39 }
 0x4e0   : > { %v1004_v43 = vpop.f32.mrf.mxu1 }
 0x4e1   : > { %1017 = vmax.xlane.f32.xlu2 %v3551_v36  ;;  %1037 = vmax.xlane.f32.xlu0 %v1004_v43 }
 0x4e9   : > { %1019 = vmax.xlane.f32.xlu2 %v982_v41 }
 0x4ec   : > { %v1012_v40 = vpop.xlane.xlu1 %1011 }
 0x4f1   : > { %1021 = vmax.xlane.f32.xlu2 %v984_v45 }
 0x4f9   : > { %1023 = vmax.xlane.f32.xlu2 %v3554_v46 }
 0x4fc   : > { %v1016_v12 = vpop.xlane.xlu1 %1015 }
 0x501   : > { %1025 = vmax.xlane.f32.xlu2 %v3556_v48 }
 0x504   : > { %v1008_v34 = vpop.xlane.xlu1 %1007 }
 0x509   : > { %1027 = vmax.xlane.f32.xlu2 %v992_v52 }
 0x511   : > { %1029 = vmax.xlane.f32.xlu2 %v994_v53 }
 0x519   : > { %1031 = vmax.xlane.f32.xlu2 %v997_v54 }
 0x521   : > { %1033 = vmax.xlane.f32.xlu2 %v999_v51 }
 0x529   : > { %1013 = vmax.xlane.f32.xlu2 %v3542_v33 }
 0x531   : > { %1009 = vmax.xlane.f32.xlu2 %v3535_v30 }
 0x549   : > { %563 = vperm.xlu2 %3011, %v533_v55  }
 0x54c   : > { %v1036_v50 = vpop.xlane.xlu2 %1035 }
 0x54d   : > { %v1053_v56 = vsub.f32 %v1002_v39, %v1036_v50 }
 0x54f   : > { %v1083_v59 = vmul.f32 1.442695, %v1053_v56 }
 0x551   : > { %3045 = vpow2.f32 %v1083_v59 }
 0x554   : > { %v3565_v57 = vpop.xlane.xlu2 %1017  ;;  %v1038_v58 = vpop.xlane.xlu0 %1037 }
 0x555   : > { %v1054_v60 = vsub.f32 %v1004_v43, %v1038_v58 }
 0x557   : > { %v1085_v49 = vmul.f32 1.442695, %v1054_v60  ;;  %v3046_v47 = vpop.eup %3045 }
 0x559   : > { %3047 = vpow2.f32 %v1085_v49  ;;  %v1044_v49 = vsub.f32 %v3551_v36, %v3565_v57 }
 0x55c   : > { %v1020_v61 = vpop.xlane.xlu2 %1019 }
 0x55d   : > { %v1045_v63 = vsub.f32 %v982_v41, %v1020_v61 }
 0x55f   : > { %v3048_v62 = vpop.eup %3047  ;;  %v1067_v1 = vmul.f32 1.442695, %v1045_v63 }
 0x560   : > { %v1094_v0 = vpack.c.bf16 %v3048_v62, %v3046_v47  ;;  %v1043_v62 = vsub.f32 %v3544_v35, %v1016_v12 }
 0x561   : > { %3049 = vpow2.f32 %v1067_v1 }
 0x562   : > { %1101 = vmatpush.bf16.xpose.msra.mxu2 %v1094_v0  ;;  %1115 = vmatpush.bf16.xpose.msrb.mxu3 %v1094_v0 }
 0x564   : > { %v1022_v2 = vpop.xlane.xlu2 %1021 }
 0x565   : > { %v1046_v3 = vsub.f32 %v984_v45, %v1022_v2  ;;  %v1063_v2 = vmul.f32 1.442695, %v1043_v62 }
 0x567   : > { %v1069_v4 = vmul.f32 1.442695, %v1046_v3  ;;  %v3050_v6 = vpop.eup %3049 }
 0x569   : > { %3051 = vpow2.f32 %v1069_v4 }
 0x56c   : > { %v1024_v5 = vpop.xlane.xlu2 %1023 }
 0x56d   : > { %v1047_v43 = vsub.f32 %v3554_v46, %v1024_v5 }
 0x56f   : > { %v3052_v44 = vpop.eup %3051 }
 0x570   : > { %v1090_v42 = vpack.c.bf16 %v3052_v44, %v3050_v6  ;;  %v1039_v44 = vsub.f32 %v3533_v29, %v1008_v34 }
 0x574   : > { %v1026_v7 = vpop.xlane.xlu2 %1025 }
 0x575   : > { %v1048_v39 = vsub.f32 %v3556_v48, %v1026_v7  ;;  %v1055_v7 = vmul.f32 1.442695, %v1039_v44 }
 0x577   : > { %v1073_v45 = vmul.f32 1.442695, %v1048_v39 }
 0x57c   : > { %v1028_v8 = vpop.xlane.xlu2 %1027 }
 0x57d   : > { %v1049_v18 = vsub.f32 %v992_v52, %v1028_v8  ;;  %v1071_v52 = vmul.f32 1.442695, %v1047_v43 }
 0x57f   : > { %v1075_v24 = vmul.f32 1.442695, %v1049_v18 }
 0x584   : > { %v1030_v9 = vpop.xlane.xlu2 %1029 }
 0x585   : > { %v1050_v15 = vsub.f32 %v994_v53, %v1030_v9 }
 0x587   : > { %v1077_v19 = vmul.f32 1.442695, %v1050_v15  ;;  %v2894_v15 = vld [vmem:[%s4101_s4 + $0x18] sm:$0xff] }
 0x58c   : > { %v1032_v10 = vpop.xlane.xlu2 %1031 }
 0x58d   : > { %v1051_v11 = vsub.f32 %v997_v54, %v1032_v10 }
 0x58f   : > { %v1079_v13 = vmul.f32 1.442695, %v1051_v11 }
 0x591   : > { %3053 = vpow2.f32 %v1079_v13  ;;  %v2884_v13 = vld [vmem:[%s3424_s30 + $0x28] sm:$0xff] }
 0x594   : > { %v1034_v37 = vpop.xlane.xlu2 %1033 }
 0x595   : > { %v1052_v14 = vsub.f32 %v999_v51, %v1034_v37  ;;  %v559_v51 = vpop.permute.xlu1 %558  ;;  %v2891_v37 = vld [vmem:[%s4101_s4] sm:$0xff] }
 0x596   : > { %v653_v56 = vadd.f32 %v3518_v20, %v559_v51  ;;  %v1065_v20 = vmul.f32 1.442695, %v1044_v49  ;;  %v2896_v51 = vld [vmem:[%s4101_s4 + $0x28] sm:$0xff] }
 0x597   : > { %v1081_v17 = vmul.f32 1.442695, %v1052_v14  ;;  %v3054_v27 = vpop.eup %3053  ;;  %v2893_v14 = vld [vmem:[%s4101_s4 + $0x10] sm:$0xff] }
 0x598   : > { %v666_v59 = vpack.c.bf16 %v653_v56, %v653_v56 }
 0x599   : > { %3055 = vpow2.f32 %v1081_v17 }
 0x59a   : > { %3057 = vpow2.f32 %v1077_v19  ;;  %v1266_v63 = vunpack.c.l.b16 %v666_v59 }
 0x59b   : > { %3059 = vpow2.f32 %v1075_v24 }
 0x59c   : > { %v1014_v22 = vpop.xlane.xlu2 %1013  ;;  %3061 = vpow2.f32 %v1073_v45 }
 0x59d   : > { %3063 = vpow2.f32 %v1071_v52  ;;  %v1042_v3 = vsub.f32 %v3542_v33, %v1014_v22 }
 0x59e   : > { %3065 = vpow2.f32 %v1065_v20 }
 0x59f   : > { %v3056_v38 = vpop.eup %3055  ;;  %3067 = vpow2.f32 %v1063_v2  ;;  %v1061_v36 = vmul.f32 1.442695, %v1042_v3 }
 0x5a0   : > { %v1093_v41 = vpack.c.bf16 %v3056_v38, %v3054_v27  ;;  %v3058_v54 = vpop.eup %3057 }
 0x5a1   : > { %v3060_v55 = vpop.eup %3059  ;;  %3069 = vpow2.f32 %v1061_v36 }
 0x5a2   : > { %1102 = vmatpush.bf16.xpose.msra.mxu2 %v1093_v41  ;;  %1116 = vmatpush.bf16.xpose.msrb.mxu3 %v1093_v41  ;;  %v1092_v50 = vpack.c.bf16 %v3058_v54, %v3060_v55  ;;  %v3062_v58 = vpop.eup %3061  ;;  %3071 = vrcp.f32 %v3540_v32  ;;  %v2895_v54 = vld [vmem:[%s4101_s4 + $0x20] sm:$0xff]  ;;  %v2897_v55 = vld [vmem:[%s4101_s4 + $0x30] sm:$0xff] }
 0x5a3   : > { %v3064_v60 = vpop.eup %3063 }
 0x5a4   : > { %v1010_v53 = vpop.xlane.xlu2 %1009  ;;  %v1091_v47 = vpack.c.bf16 %v3062_v58, %v3064_v60  ;;  %v3066_v57 = vpop.eup %3065 }
 0x5a5   : > { %v3068_v35 = vpop.eup %3067  ;;  %v1040_v5 = vsub.f32 %v3535_v30, %v1010_v53 }
 0x5a6   : > { %v1089_v6 = vpack.c.bf16 %v3066_v57, %v3068_v35 }
 0x5a7   : > { %v1057_v33 = vmul.f32 1.442695, %v1040_v5 }
 0x5aa   : > { %1103 = vmatpush.bf16.xpose.msra.mxu2 %v1092_v50  ;;  %1117 = vmatpush.bf16.xpose.msrb.mxu3 %v1092_v50 }
 0x5ac   : > { %v564_v48 = vpop.permute.xlu2 %563 }
 0x5ad   : > { %v655_v46 = vadd.f32 %v3520_v21, %v564_v48  ;;  %v1041_v21 = vsub.f32 %v3537_v31, %v1012_v40  ;;  %v3070_v31 = vpop.eup %3069  ;;  %v2898_v48 = vld [vmem:[%s4101_s4 + $0x38] sm:$0xff] }
 0x5ae   : > { %v3072_v8 = vpop.eup %3071 }
 0x5af   : > { %v667_v61 = vpack.c.bf16 %v655_v46, %v655_v46  ;;  %v1059_v4 = vmul.f32 1.442695, %v1041_v21  ;;  %v894_v40 = vperm.slane %v3072_v8, 0 }
 0x5b1   : > { %v1267_v0 = vunpack.c.l.b16 %v667_v61  ;;  %3073 = vpow2.f32 %v1059_v4  ;;  %v895_v32 = vmul.f32 %v894_v40, %v3528_v26  ;;  %v896_v29 = vmul.f32 %v894_v40, %v3531_v28  ;;  %v2892_v26 = vld [vmem:[%s4101_s4 + $0x8] sm:$0xff]  ;;  %v2881_v28 = vld [vmem:[%s3424_s30 + $0x10] sm:$0xff] }
 0x5b2   : > { %1104 = vmatpush.bf16.xpose.msra.mxu2 %v1091_v47  ;;  %1118 = vmatpush.bf16.xpose.msrb.mxu3 %v1091_v47  ;;  %3075 = vpow2.f32 %v1057_v33  ;;  %v535_v33 = vld [vmem:[%s4100_s3 + $0x38] sm:$0xff] }
 0x5b3   : > { %v1268_v1 = vpack.c.b16 %v1267_v0, %v1266_v63  ;;  %3077 = vpow2.f32 %v1055_v7  ;;  %v897_v12 = vpack.c.bf16 %v896_v29, %v895_v32 }
 0x5b5   : > { %1270 = vxpose.xlu1.c.b16.start.end [1/1] (short) %v1268_v1, 128 }
 0x5ba   : > { %1105 = vmatpush.bf16.xpose.msra.mxu2 %v1090_v42  ;;  %1119 = vmatpush.bf16.xpose.msrb.mxu3 %v1090_v42  ;;  %v3074_v42 = vpop.eup %3073 }
 0x5bb   : > { %v1088_v9 = vpack.c.bf16 %v3070_v31, %v3074_v42  ;;  %v3076_v30 = vpop.eup %3075  ;;  %v534_v42 = vld [vmem:[%s4100_s3 + $0x30] sm:$0xff] }
 0x5bc   : > { %v3078_v10 = vpop.eup %3077 }
 0x5bd   : > { %v1087_v11 = vpack.c.bf16 %v3076_v30, %v3078_v10 }
 0x5c2   : > { %1106 = vmatpush.bf16.xpose.msra.mxu2 %v1089_v6  ;;  %1120 = vmatpush.bf16.xpose.msrb.mxu3 %v1089_v6 }
 0x5ca   : > { %1107 = vmatpush.bf16.xpose.msra.mxu2 %v1088_v9  ;;  %1121 = vmatpush.bf16.xpose.msrb.mxu3 %v1088_v9 }
 0x5d2   : > { %1108 = vmatpush.bf16.xpose.msra.mxu2 %v1087_v11  ;;  %1122 = vmatpush.bf16.xpose.msrb.mxu3 %v1087_v11 }
 0x5d9   : > { %1109 = vmatmul.bf16.vlgmr.msra.gmra.mxu2 %v2884_v13  ;;  %1123 = vmatmul.bf16.vlgmr.msrb.gmra.mxu3 %v3250_v16 }
 0x5da   : > { %1242 = vmatpush.bf16.msrb.mxu2 %v897_v12  ;;  %2929 = vmatpush.bf16.msra.mxu3 %v2881_v28 }
 0x5de   : > { %1323 = vmatpush.bf16.msra.mxu2 %v2881_v28 }
 0x5e9   : > { %2681 = vmatmul.msk.bf16.vlgmr.msrb.gmra.mxu2 %vm698_vm1, %v2891_v37 }
 0x5f9   : > { %2682 = vmatmul.msk.bf16.gmra.mxu2 %vm698_vm1, %v2892_v26 }
 0x609   : > { %2683 = vmatmul.msk.bf16.gmra.mxu2 %vm698_vm1, %v2893_v14 }
 0x619   : > { %2684 = vmatmul.msk.bf16.gmra.mxu2 %vm698_vm1, %v2894_v15 }
 0x65c   : > { %v1110_v22 = vpop.f32.mrf.mxu2  ;;  %v1124_v24 = vpop.f32.mrf.mxu3 }
 0x65d   : > { %3079 = vrcp.f32 %v1124_v24 }
 0x661   : > { %v1278_v17 = vpop.trf.xlu1 }
 0x662   : > { %2689 = vmatmul.msk.bf16.vlgmr.msra.gmra.mxu2 %vm698_vm1, %v1278_v17 }
 0x663   : > { %v3080_v27 = vpop.eup %3079 }
 0x664   : > { %v1129_v34 = vperm.slane %v3080_v27, 0  ;;  %v1126_v38 = vpop.f32.mrf.mxu3  ;;  %v1112_v39 = vpop.f32.mrf.mxu2 }
 0x666   : > { %v1130_v41 = vmul.f32 %v1129_v34, %v1110_v22  ;;  %v1131_v43 = vmul.f32 %v1129_v34, %v1112_v39 }
 0x668   : > { %v1132_v45 = vpack.c.bf16 %v1131_v43, %v1130_v41 }
 0x66a   : > { %1181 = vmatpush.bf16.msrb.mxu1 %v1132_v45 }
 0x66c   : > { %v3624_v59 = vpop.f32.mrf.mxu2 }
 0x66d   : > { %2661 = vmatmul.msk.bf16.vlgmr.msrb.gmra.mxu1 %vm698_vm1, %v2895_v54 }
 0x671   : > { %v1279_v18 = vpop.trf.xlu1 }
 0x672   : > { %2690 = vmatmul.msk.bf16.vlgmr.msra.gmra.mxu3 %vm698_vm1, %v1279_v18 }
 0x674   : > { %v3626_v46 = vpop.f32.mrf.mxu2 }
 0x67c   : > { %v3628_v60 = vpop.f32.mrf.mxu2 }
 0x67d   : > { %2662 = vmatmul.msk.bf16.gmra.mxu1 %vm698_vm1, %v2896_v51 }
 0x681   : > { %v1280_v19 = vpop.trf.xlu1 }
 0x682   : > { %2691 = vmatmul.msk.bf16.gmra.mxu3 %vm698_vm1, %v1280_v19 }
 0x684   : > { %v3632_v61 = vpop.f32.mrf.mxu2 }
 0x68c   : > { %v3636_v62 = vpop.f32.mrf.mxu2 }
 0x68d   : > { %2663 = vmatmul.msk.bf16.gmra.mxu1 %vm698_vm1, %v2897_v55 }
 0x691   : > { %v1281_v53 = vpop.trf.xlu1 }
 0x692   : > { %2692 = vmatmul.msk.bf16.gmra.mxu3 %vm698_vm1, %v1281_v53 }
 0x694   : > { %v3640_v0 = vpop.f32.mrf.mxu2 }
 0x69c   : > { %v3646_v2 = vpop.f32.mrf.mxu2 }
 0x69d   : > { %2664 = vmatmul.msk.bf16.gmra.mxu1 %vm698_vm1, %v2898_v48 }
 0x6a1   : > { %v1282_v52 = vpop.trf.xlu1 }
 0x6a2   : > { %2693 = vmatmul.msk.bf16.gmra.mxu3 %vm698_vm1, %v1282_v52 }
 0x6a4   : > { %v3651_v21 = vpop.f32.mrf.mxu2 }
 0x6b1   : > { %v1283_v50 = vpop.trf.xlu1 }
 0x6b2   : > { %2694 = vmatmul.msk.bf16.gmra.mxu3 %vm698_vm1, %v1283_v50 }
 0x6c1   : > { %v1284_v56 = vpop.trf.xlu1 }
 0x6c2   : > { %2695 = vmatmul.msk.bf16.gmra.mxu3 %vm698_vm1, %v1284_v56 }
 0x6d1   : > { %v1285_v58 = vpop.trf.xlu1 }
 0x6d2   : > { %2696 = vmatmul.msk.bf16.gmra.mxu3 %vm698_vm1, %v1285_v58 }
 0x6e5   : > { %v3656_v57 = vpop.f32.mrf.mxu2 }
 0x6ed   : > { %v3661_v35 = vpop.f32.mrf.mxu2 }
 0x6f5   : > { %v3630_v49 = vpop.f32.mrf.mxu3 }
 0x6fd   : > { %v3634_v47 = vpop.f32.mrf.mxu3 }
 0x705   : > { %v3638_v63 = vpop.f32.mrf.mxu3 }
 0x70d   : > { %v3642_v20 = vpop.f32.mrf.mxu3 }
 0x715   : > { %v3644_v1 = vpop.f32.mrf.mxu3 }
 0x71d   : > { %v3648_v3 = vpop.f32.mrf.mxu3 }
 0x71e   : > { %1379 = vmax.xlane.f32.xlu0 %v3648_v3 }
 0x725   : > { %v3653_v36 = vpop.f32.mrf.mxu3 }
 0x726   : > { %1375 = vmax.xlane.f32.xlu0 %v3642_v20 }
 0x72d   : > { %v3658_v4 = vpop.f32.mrf.mxu3 }
 0x72e   : > { %1371 = vmax.xlane.f32.xlu0 %v3634_v47 }
 0x735   : > { %v1350_v5 = vpop.f32.mrf.mxu3 }
 0x736   : > { %1367 = vmax.xlane.f32.xlu0 %v3661_v35 }
 0x73d   : > { %v1352_v6 = vpop.f32.mrf.mxu3 }
 0x745   : > { %v1355_v44 = vpop.f32.mrf.mxu3 }
 0x746   : > { %1389 = vmax.xlane.f32.xlu2 %v1355_v44 }
 0x74a   : > { %573 = vperm.xlu0 %3010, %v535_v33  }
 0x74d   : > { %v1357_v31 = vpop.f32.mrf.mxu3 }
 0x74e   : > { %1385 = vmax.xlane.f32.xlu2 %v1350_v5  ;;  %1391 = vmax.xlane.f32.xlu1 %v1357_v31 }
 0x755   : > { %v1360_v7 = vpop.f32.mrf.mxu3 }
 0x756   : > { %1387 = vmax.xlane.f32.xlu2 %v1352_v6 }
 0x75d   : > { %v1362_v8 = vpop.f32.mrf.mxu3 }
 0x75e   : > { %1381 = vmax.xlane.f32.xlu2 %v3653_v36 }
 0x766   : > { %1383 = vmax.xlane.f32.xlu2 %v3658_v4 }
 0x76e   : > { %1377 = vmax.xlane.f32.xlu2 %v3644_v1 }
 0x776   : > { %1393 = vmax.xlane.f32.xlu2 %v1360_v7 }
 0x77e   : > { %1395 = vmax.xlane.f32.xlu2 %v1362_v8 }
 0x786   : > { %1373 = vmax.xlane.f32.xlu2 %v3638_v63 }
 0x78e   : > { %1369 = vmax.xlane.f32.xlu2 %v3630_v49 }
 0x791   : > { %v1380_v11 = vpop.xlane.xlu0 %1379 }
 0x796   : > { %1365 = vmax.xlane.f32.xlu2 %v3656_v57 }
 0x799   : > { %v3676_v37 = vpop.xlane.xlu0 %1375 }
 0x7a1   : > { %v3678_v24 = vpop.xlane.xlu0 %1371 }
 0x7a9   : > { %v3680_v55 = vpop.xlane.xlu0 %1367 }
 0x7ae   : > { %568 = vperm.xlu2 %3011, %v534_v42  }
 0x7b9   : > { %v1390_v9 = vpop.xlane.xlu2 %1389 }
 0x7ba   : > { %v1409_v19 = vsub.f32 %v1355_v44, %v1390_v9  ;;  %v1404_v9 = vsub.f32 %v3648_v3, %v1380_v11 }
 0x7bc   : > { %v1437_v34 = vmul.f32 1.442695, %v1409_v19  ;;  %v1400_v19 = vsub.f32 %v3634_v47, %v3678_v24 }
 0x7c1   : > { %v1386_v40 = vpop.xlane.xlu2 %1385  ;;  %v1392_v26 = vpop.xlane.xlu1 %1391 }
 0x7c2   : > { %v1410_v17 = vsub.f32 %v1357_v31, %v1392_v26  ;;  %v1407_v45 = vsub.f32 %v1350_v5, %v1386_v40  ;;  %v574_v31 = vpop.permute.xlu0 %573 }
 0x7c4   : > { %v1439_v22 = vmul.f32 1.442695, %v1410_v17  ;;  %v1433_v51 = vmul.f32 1.442695, %v1407_v45 }
 0x7c9   : > { %v1388_v30 = vpop.xlane.xlu2 %1387 }
 0x7ca   : > { %v1408_v41 = vsub.f32 %v1352_v6, %v1388_v30 }
 0x7cc   : > { %v1435_v53 = vmul.f32 1.442695, %v1408_v41 }
 0x7d1   : > { %v1382_v32 = vpop.xlane.xlu2 %1381 }
 0x7d2   : > { %v1405_v58 = vsub.f32 %v3653_v36, %v1382_v32  ;;  %v1427_v32 = vmul.f32 1.442695, %v1404_v9 }
 0x7d4   : > { %v1429_v33 = vmul.f32 1.442695, %v1405_v58 }
 0x7d9   : > { %v1384_v29 = vpop.xlane.xlu2 %1383 }
 0x7da   : > { %v1406_v56 = vsub.f32 %v3658_v4, %v1384_v29  ;;  %v660_v4 = vadd.f32 %v3525_v25, %v574_v31  ;;  %v1402_v25 = vsub.f32 %v3642_v20, %v3676_v37 }
 0x7dc   : > { %v1431_v6 = vmul.f32 1.442695, %v1406_v56  ;;  %v669_v29 = vpack.c.bf16 %v660_v4, %v660_v4  ;;  %v1423_v17 = vmul.f32 1.442695, %v1402_v25 }
 0x7de   : > { %v1572_v3 = vunpack.c.l.b16 %v669_v29  ;;  %v2900_v29 = vld [vmem:[%s4101_s4 + $0x48] sm:$0xff] }
 0x7e1   : > { %v1378_v10 = vpop.xlane.xlu2 %1377 }
 0x7e9   : > { %v1394_v12 = vpop.xlane.xlu2 %1393 }
 0x7ea   : > { %v1411_v13 = vsub.f32 %v1360_v7, %v1394_v12 }
 0x7ec   : > { %v1441_v28 = vmul.f32 1.442695, %v1411_v13 }
 0x7ee   : > { %3081 = vpow2.f32 %v1441_v28 }
 0x7f1   : > { %v1396_v14 = vpop.xlane.xlu2 %1395 }
 0x7f2   : > { %v1412_v15 = vsub.f32 %v1362_v8, %v1396_v14  ;;  %v1403_v8 = vsub.f32 %v3644_v1, %v1378_v10 }
 0x7f4   : > { %v1443_v18 = vmul.f32 1.442695, %v1412_v15  ;;  %v3082_v38 = vpop.eup %3081  ;;  %v1425_v36 = vmul.f32 1.442695, %v1403_v8 }
 0x7f6   : > { %3083 = vpow2.f32 %v1443_v18 }
 0x7f7   : > { %3085 = vpow2.f32 %v1439_v22  ;;  %v1419_v22 = vmul.f32 1.442695, %v1400_v19 }
 0x7f8   : > { %3087 = vpow2.f32 %v1437_v34 }
 0x7f9   : > { %v1374_v27 = vpop.xlane.xlu2 %1373  ;;  %3089 = vpow2.f32 %v1435_v53  ;;  %v2882_v53 = vld [vmem:[%s3424_s30 + $0x18] sm:$0xff] }
 0x7fa   : > { %3091 = vpow2.f32 %v1433_v51  ;;  %v1401_v26 = vsub.f32 %v3638_v63, %v1374_v27 }
 0x7fb   : > { %3093 = vpow2.f32 %v1431_v6 }
 0x7fc   : > { %v3084_v39 = vpop.eup %3083  ;;  %3095 = vpow2.f32 %v1429_v33  ;;  %v1421_v28 = vmul.f32 1.442695, %v1401_v26 }
 0x7fd   : > { %v1452_v43 = vpack.c.bf16 %v3084_v39, %v3082_v38  ;;  %v3086_v52 = vpop.eup %3085  ;;  %3097 = vpow2.f32 %v1425_v36 }
 0x7fe   : > { %v3088_v50 = vpop.eup %3087  ;;  %3099 = vpow2.f32 %v1427_v32 }
 0x7ff   : > { %1459 = vmatpush.bf16.xpose.msra.mxu1 %v1452_v43  ;;  %1473 = vmatpush.bf16.xpose.msrb.mxu3 %v1452_v43  ;;  %v1451_v48 = vpack.c.bf16 %v3086_v52, %v3088_v50  ;;  %v3090_v44 = vpop.eup %3089  ;;  %3101 = vpow2.f32 %v1421_v28  ;;  %v1183_v52 = vpop.f32.mrf.mxu1 }
 0x800   : > { %v3092_v7 = vpop.eup %3091  ;;  %3103 = vpow2.f32 %v1423_v17  ;;  %v1245_v17 = vadd.f32 %v3624_v59, %v1183_v52 }
 0x801   : > { %v1370_v54 = vpop.xlane.xlu2 %1369  ;;  %v1450_v42 = vpack.c.bf16 %v3090_v44, %v3092_v7  ;;  %v3094_v30 = vpop.eup %3093 }
 0x802   : > { %v3096_v13 = vpop.eup %3095  ;;  %v1399_v18 = vsub.f32 %v3630_v49, %v1370_v54  ;;  %v1398_v49 = vsub.f32 %v3661_v35, %v3680_v55  ;;  %v2885_v35 = vld [vmem:[%s3424_s30 + $0x30] sm:$0xff] }
 0x803   : > { %v1449_v10 = vpack.c.bf16 %v3094_v30, %v3096_v13  ;;  %v3098_v15 = vpop.eup %3097  ;;  %v2899_v30 = vld [vmem:[%s4101_s4 + $0x40] sm:$0xff]  ;;  %v2901_v13 = vld [vmem:[%s4101_s4 + $0x50] sm:$0xff] }
 0x804   : > { %v1417_v20 = vmul.f32 1.442695, %v1399_v18  ;;  %v1415_v24 = vmul.f32 1.442695, %v1398_v49 }
 0x806   : > { %3105 = vpow2.f32 %v1417_v20 }
 0x807   : > { %1460 = vmatpush.bf16.xpose.msra.mxu1 %v1451_v48  ;;  %1474 = vmatpush.bf16.xpose.msrb.mxu3 %v1451_v48  ;;  %3107 = vpow2.f32 %v1419_v22  ;;  %v3700_v51 = vpop.f32.mrf.mxu1 }
 0x809   : > { %v1366_v5 = vpop.xlane.xlu2 %1365 }
 0x80a   : > { %v1397_v34 = vsub.f32 %v3656_v57, %v1366_v5 }
 0x80c   : > { %v1413_v39 = vmul.f32 1.442695, %v1397_v34 }
 0x80e   : > { %3109 = vpow2.f32 %v1413_v39 }
 0x80f   : > { %1461 = vmatpush.bf16.xpose.msra.mxu1 %v1450_v42  ;;  %1475 = vmatpush.bf16.xpose.msrb.mxu3 %v1450_v42  ;;  %3111 = vpow2.f32 %v1415_v24  ;;  %v1188_v55 = vpop.f32.mrf.mxu1 }
 0x811   : > { %v569_v40 = vpop.permute.xlu2 %568 }
 0x812   : > { %v658_v12 = vadd.f32 %v3523_v23, %v569_v40  ;;  %v3100_v23 = vpop.eup %3099 }
 0x813   : > { %v1448_v63 = vpack.c.bf16 %v3100_v23, %v3098_v15  ;;  %v3102_v37 = vpop.eup %3101 }
 0x814   : > { %v668_v1 = vpack.c.bf16 %v658_v12, %v658_v12  ;;  %v3104_v27 = vpop.eup %3103 }
 0x815   : > { %v1447_v38 = vpack.c.bf16 %v3104_v27, %v3102_v37  ;;  %v3106_v47 = vpop.eup %3105  ;;  %v1250_v37 = vadd.f32 %v3628_v60, %v1188_v55  ;;  %v2206_v55 = vld [vmem:[%s4105_s8 + $0x70] sm:$0xff] }
 0x816   : > { %v1571_v11 = vunpack.c.l.b16 %v668_v1  ;;  %v3108_v41 = vpop.eup %3107  ;;  %v2902_v1 = vld [vmem:[%s4101_s4 + $0x58] sm:$0xff] }
 0x817   : > { %1462 = vmatpush.bf16.xpose.msra.mxu1 %v1449_v10  ;;  %1476 = vmatpush.bf16.xpose.msrb.mxu3 %v1449_v10  ;;  %v1446_v43 = vpack.c.bf16 %v3108_v41, %v3106_v47  ;;  %v3110_v45 = vpop.eup %3109  ;;  %v3702_v50 = vpop.f32.mrf.mxu1 }
 0x818   : > { %v1573_v14 = vpack.c.b16 %v1572_v3, %v1571_v11  ;;  %v3112_v57 = vpop.eup %3111 }
 0x819   : > { %v1445_v54 = vpack.c.bf16 %v3112_v57, %v3110_v45 }
 0x81a   : > { %1575 = vxpose.xlu2.c.b16.start.end [1/1] (short) %v1573_v14, 128 }
 0x81f   : > { %1463 = vmatpush.bf16.xpose.msra.mxu1 %v1448_v63  ;;  %1477 = vmatpush.bf16.xpose.msrb.mxu3 %v1448_v63  ;;  %v1193_v56 = vpop.f32.mrf.mxu1 }
 0x820   : > { %v1255_v49 = vadd.f32 %v3636_v62, %v1193_v56  ;;  %v1876_v62 = vld [vmem:[%s4102_s5 + $0x10] sm:$0xff] }
 0x827   : > { %1464 = vmatpush.bf16.xpose.msra.mxu1 %v1447_v38  ;;  %1478 = vmatpush.bf16.xpose.msrb.mxu3 %v1447_v38  ;;  %v3704_v48 = vpop.f32.mrf.mxu1 }
 0x82f   : > { %1465 = vmatpush.bf16.xpose.msra.mxu1 %v1446_v43  ;;  %1479 = vmatpush.bf16.xpose.msrb.mxu3 %v1446_v43  ;;  %v1198_v58 = vpop.f32.mrf.mxu1 }
 0x830   : > { %v1260_v43 = vadd.f32 %v3646_v2, %v1198_v58  ;;  %v1874_v2 = vld [vmem:[%s4102_s5] sm:$0xff] }
 0x831   : > { %v2204_v58 = vld [vmem:[%s4105_s8 + $0x60] sm:$0xff] }
 0x837   : > { %1466 = vmatpush.bf16.xpose.msra.mxu1 %v1445_v54  ;;  %1480 = vmatpush.bf16.xpose.msrb.mxu3 %v1445_v54  ;;  %v3706_v6 = vpop.f32.mrf.mxu1 }
 0x83e   : > { %1481 = vmatmul.bf16.vlgmr.msrb.gmra.mxu3 %v3250_v16  ;;  %1467 = vmatmul.bf16.vlgmr.msra.gmra.mxu1 %v2885_v35 }
 0x83f   : > { %1628 = vmatpush.bf16.msrb.mxu1 %v2882_v53  ;;  %v1881_v53 = vld [vmem:[%s4102_s5 + $0x38] sm:$0xff] }
 0x8bb   : > { %v1583_v5 = vpop.trf.xlu2  ;;  %v1468_v44 = vpop.f32.mrf.mxu1 }
 0x8bc   : > { %2733 = vmatmul.msk.bf16.vlgmr.msrb.gmra.mxu1 %vm698_vm1, %v1583_v5 }
 0x8c1   : > { %v1482_v33 = vpop.f32.mrf.mxu3 }
 0x8c2   : > { %3113 = vrcp.f32 %v1482_v33 }
 0x8c3   : > { %v1470_v7 = vpop.f32.mrf.mxu1 }
 0x8c8   : > { %v3114_v31 = vpop.eup %3113 }
 0x8c9   : > { %v1487_v8 = vperm.slane %v3114_v31, 0  ;;  %v1484_v42 = vpop.f32.mrf.mxu3  ;;  %v2200_v31 = vld [vmem:[%s4105_s8 + $0x40] sm:$0xff] }
 0x8ca   : > { %v2196_v42 = vld [vmem:[%s4105_s8 + $0x20] sm:$0xff] }
 0x8cb   : > { %v1488_v9 = vmul.f32 %v1487_v8, %v1468_v44  ;;  %v1489_v4 = vmul.f32 %v1487_v8, %v1470_v7  ;;  %v1584_v36 = vpop.trf.xlu2  ;;  %v2202_v44 = vld [vmem:[%s4105_s8 + $0x50] sm:$0xff]  ;;  %v2341_v8 = vld [vmem:[%s4107_s10 + $0x28] sm:$0xff] }
 0x8cc   : > { %2734 = vmatmul.msk.bf16.gmra.mxu1 %vm698_vm1, %v1584_v36  ;;  %v2198_v7 = vld [vmem:[%s4105_s8 + $0x30] sm:$0xff]  ;;  %v2336_v36 = vld [vmem:[%s4107_s10] sm:$0xff] }
 0x8cd   : > { %v1490_v40 = vpack.c.bf16 %v1489_v4, %v1488_v9  ;;  %v2194_v9 = vld [vmem:[%s4105_s8 + $0x10] sm:$0xff]  ;;  %v2192_v4 = vld [vmem:[%s4105_s8] sm:$0xff] }
 0x8cf   : > { %1539 = vmatpush.bf16.msrb.mxu2 %v1490_v40  ;;  %v2338_v40 = vld [vmem:[%s4107_s10 + $0x10] sm:$0xff] }
 0x8d2   : > { %2725 = vmatmul.msk.bf16.vlgmr.msrb.gmra.mxu2 %vm698_vm1, %v2899_v30  ;;  %v2340_v30 = vld [vmem:[%s4107_s10 + $0x20] sm:$0xff] }
 0x8db   : > { %v1585_v32 = vpop.trf.xlu2 }
 0x8dc   : > { %2735 = vmatmul.msk.bf16.gmra.mxu1 %vm698_vm1, %v1585_v32  ;;  %v2343_v32 = vld [vmem:[%s4107_s10 + $0x38] sm:$0xff] }
 0x8e2   : > { %2726 = vmatmul.msk.bf16.gmra.mxu2 %vm698_vm1, %v2900_v29  ;;  %v1880_v29 = vld [vmem:[%s4102_s5 + $0x30] sm:$0xff] }
 0x8eb   : > { %v1586_v12 = vpop.trf.xlu2 }
 0x8ec   : > { %2736 = vmatmul.msk.bf16.gmra.mxu1 %vm698_vm1, %v1586_v12  ;;  %v1878_v12 = vld [vmem:[%s4102_s5 + $0x20] sm:$0xff] }
 0x8f2   : > { %2727 = vmatmul.msk.bf16.gmra.mxu2 %vm698_vm1, %v2901_v13 }
 0x8fb   : > { %v1587_v26 = vpop.trf.xlu2 }
 0x8fc   : > { %2737 = vmatmul.msk.bf16.gmra.mxu1 %vm698_vm1, %v1587_v26 }
 0x902   : > { %2728 = vmatmul.msk.bf16.gmra.mxu2 %vm698_vm1, %v2902_v1  ;;  %v1879_v1 = vld [vmem:[%s4102_s5 + $0x28] sm:$0xff] }
 0x90b   : > { %v1588_v10 = vpop.trf.xlu2 }
 0x90c   : > { %2738 = vmatmul.msk.bf16.gmra.mxu1 %vm698_vm1, %v1588_v10 }
 0x91b   : > { %v1589_v25 = vpop.trf.xlu2 }
 0x91c   : > { %2739 = vmatmul.msk.bf16.gmra.mxu1 %vm698_vm1, %v1589_v25 }
 0x92b   : > { %v1590_v3 = vpop.trf.xlu2 }
 0x92c   : > { %2740 = vmatmul.msk.bf16.gmra.mxu1 %vm698_vm1, %v1590_v3 }
 0x939   : > { %v3732_v11 = vpop.f32.mrf.mxu1 }
 0x941   : > { %v3734_v28 = vpop.f32.mrf.mxu1 }
 0x949   : > { %v3736_v14 = vpop.f32.mrf.mxu1 }
 0x951   : > { %v3738_v15 = vpop.f32.mrf.mxu1 }
 0x955   : > { %v1541_v23 = vpop.f32.mrf.mxu2 }
 0x956   : > { %v3741_v18 = vadd.f32 %v1541_v23, %v1245_v17 }
 0x959   : > { %v3743_v63 = vpop.f32.mrf.mxu1 }
 0x95d   : > { %v3745_v19 = vpop.f32.mrf.mxu2 }
 0x961   : > { %v3747_v20 = vpop.f32.mrf.mxu1 }
 0x962   : > { %1680 = vmax.xlane.f32.xlu1 %v3747_v20 }
 0x965   : > { %v1546_v22 = vpop.f32.mrf.mxu2 }
 0x966   : > { %v3751_v27 = vadd.f32 %v1546_v22, %v1250_v37  ;;  %v1877_v22 = vld [vmem:[%s4102_s5 + $0x18] sm:$0xff] }
 0x969   : > { %v3753_v34 = vpop.f32.mrf.mxu1 }
 0x96a   : > { %1676 = vmax.xlane.f32.xlu1 %v3738_v15 }
 0x96d   : > { %v3756_v59 = vpop.f32.mrf.mxu2 }
 0x971   : > { %v3758_v38 = vpop.f32.mrf.mxu1 }
 0x972   : > { %1672 = vmax.xlane.f32.xlu1 %v3734_v28 }
 0x975   : > { %v1551_v39 = vpop.f32.mrf.mxu2 }
 0x976   : > { %v3762_v47 = vadd.f32 %v1551_v39, %v1255_v49 }
 0x979   : > { %v3764_v24 = vpop.f32.mrf.mxu1 }
 0x97d   : > { %v3766_v60 = vpop.f32.mrf.mxu2 }
 0x981   : > { %v3768_v41 = vpop.f32.mrf.mxu1 }
 0x985   : > { %v1556_v45 = vpop.f32.mrf.mxu2 }
 0x986   : > { %v3771_v57 = vadd.f32 %v1556_v45, %v1260_v43 }
 0x989   : > { %v3776_v54 = vpop.f32.mrf.mxu1 }
 0x98b   : > { %1919 = vperm.xlu1 %3012, %v1881_v53  }
 0x991   : > { %v3781_v35 = vpop.f32.mrf.mxu1 }
 0x993   : > { %1894 = vperm.xlu1 %3012, %v1876_v62  }
 0x999   : > { %v1660_v52 = vpop.f32.mrf.mxu1 }
 0x99b   : > { %1884 = vperm.xlu1 %3012, %v1874_v2  }
 0x9a1   : > { %v3789_v56 = vpop.f32.mrf.mxu1 }
 0x9a3   : > { %2280 = vperm.xlu1 %3012, %v2206_v55  }
 0x9a9   : > { %v1665_v5 = vpop.f32.mrf.mxu1 }
 0x9aa   : > { %1698 = vmax.xlane.f32.xlu0 %v1665_v5 }
 0x9ab   : > { %2270 = vperm.xlu1 %3012, %v2204_v58  }
 0x9b1   : > { %v1667_v33 = vpop.f32.mrf.mxu1 }
 0x9b2   : > { %1694 = vmax.xlane.f32.xlu0 %v1660_v52  ;;  %1700 = vmax.xlane.f32.xlu2 %v1667_v33 }
 0x9b3   : > { %2260 = vperm.xlu1 %3012, %v2202_v44  }
 0x9ba   : > { %1696 = vmax.xlane.f32.xlu0 %v3789_v56 }
 0x9bb   : > { %2250 = vperm.xlu1 %3012, %v2200_v31  }
 0x9c2   : > { %1690 = vmax.xlane.f32.xlu0 %v3776_v54 }
 0x9c3   : > { %2240 = vperm.xlu1 %3012, %v2198_v7  }
 0x9ca   : > { %1692 = vmax.xlane.f32.xlu0 %v3781_v35  ;;  %2371 = vperm.xlu2 %3011, %v2341_v8  }
 0x9cb   : > { %2230 = vperm.xlu1 %3012, %v2196_v42  }
 0x9d2   : > { %1686 = vmax.xlane.f32.xlu0 %v3764_v24 }
 0x9d3   : > { %2220 = vperm.xlu1 %3012, %v2194_v9   ;;  %v2205_v9 = vld [vmem:[%s4105_s8 + $0x68] sm:$0xff] }
 0x9da   : > { %1688 = vmax.xlane.f32.xlu0 %v3768_v41 }
 0x9db   : > { %2210 = vperm.xlu1 %3012, %v2192_v4  }
 0x9e2   : > { %1682 = vmax.xlane.f32.xlu0 %v3753_v34 }
 0x9e3   : > { %2346 = vperm.xlu1 %3012, %v2336_v36  }
 0x9ea   : > { %1684 = vmax.xlane.f32.xlu0 %v3758_v38 }
 0x9eb   : > { %2356 = vperm.xlu1 %3012, %v2338_v40  }
 0x9f2   : > { %1678 = vmax.xlane.f32.xlu0 %v3743_v63 }
 0x9f3   : > { %2366 = vperm.xlu1 %3012, %v2340_v30  }
 0x9fa   : > { %1674 = vmax.xlane.f32.xlu0 %v3736_v14 }
 0x9fb   : > { %2381 = vperm.xlu1 %3012, %v2343_v32  }
 0xa02   : > { %1670 = vmax.xlane.f32.xlu0 %v3732_v11 }
 0xa16   : > { %1914 = vperm.xlu0 %3010, %v1880_v29  }
 0xa1d   : > { %v1699_v13 = vpop.xlane.xlu0 %1698 }
 0xa1e   : > { %1904 = vperm.xlu0 %3010, %v1878_v12   ;;  %v1716_v26 = vsub.f32 %v1665_v5, %v1699_v13 }
 0xa20   : > { %v1746_v25 = vmul.f32 1.442695, %v1716_v26  ;;  %v2201_v26 = vld [vmem:[%s4105_s8 + $0x48] sm:$0xff] }
 0xa22   : > { %3115 = vpow2.f32 %v1746_v25 }
 0xa25   : > { %v1695_v10 = vpop.xlane.xlu0 %1694  ;;  %v1701_v3 = vpop.xlane.xlu2 %1700 }
 0xa26   : > { %1909 = vperm.xlu0 %3010, %v1879_v1   ;;  %v1717_v17 = vsub.f32 %v1667_v33, %v1701_v3  ;;  %v1714_v23 = vsub.f32 %v1660_v52, %v1695_v10  ;;  %v1875_v52 = vld [vmem:[%s4102_s5 + $0x8] sm:$0xff]  ;;  %v2207_v33 = vld [vmem:[%s4105_s8 + $0x78] sm:$0xff] }
 0xa28   : > { %v1748_v37 = vmul.f32 1.442695, %v1717_v17  ;;  %v1742_v49 = vmul.f32 1.442695, %v1714_v23  ;;  %v3116_v45 = vpop.eup %3115  ;;  %v1681_v17 = vpop.xlane.xlu1 %1680 }
 0xa2a   : > { %3117 = vpow2.f32 %v1748_v37 }
 0xa2b   : > { %3119 = vpow2.f32 %v1742_v49 }
 0xa2d   : > { %v1697_v39 = vpop.xlane.xlu0 %1696 }
 0xa2e   : > { %v1715_v43 = vsub.f32 %v3789_v56, %v1697_v39  ;;  %1899 = vperm.xlu0 %3010, %v1877_v22   ;;  %v1707_v39 = vsub.f32 %v3747_v20, %v1681_v17  ;;  %v2195_v20 = vld [vmem:[%s4105_s8 + $0x18] sm:$0xff] }
 0xa30   : > { %v1744_v53 = vmul.f32 1.442695, %v1715_v43  ;;  %v3118_v62 = vpop.eup %3117  ;;  %v1677_v43 = vpop.xlane.xlu1 %1676 }
 0xa31   : > { %v1757_v2 = vpack.c.bf16 %v3118_v62, %v3116_v45  ;;  %v3120_v58 = vpop.eup %3119  ;;  %v1728_v45 = vmul.f32 1.442695, %v1707_v39 }
 0xa32   : > { %3121 = vpow2.f32 %v1744_v53 }
 0xa33   : > { %1764 = vmatpush.bf16.xpose.msra.mxu1 %v1757_v2  ;;  %1778 = vmatpush.bf16.xpose.msra.mxu2 %v1757_v2 }
 0xa35   : > { %v1691_v55 = vpop.xlane.xlu0 %1690 }
 0xa36   : > { %1889 = vperm.xlu0 %3010, %v1875_v52   ;;  %v1712_v44 = vsub.f32 %v3776_v54, %v1691_v55 }
 0xa38   : > { %v3122_v5 = vpop.eup %3121  ;;  %v1738_v31 = vmul.f32 1.442695, %v1712_v44 }
 0xa39   : > { %v1756_v56 = vpack.c.bf16 %v3122_v5, %v3120_v58 }
 0xa3a   : > { %3123 = vpow2.f32 %v1738_v31 }
 0xa3b   : > { %1765 = vmatpush.bf16.xpose.msra.mxu1 %v1756_v56  ;;  %1779 = vmatpush.bf16.xpose.msra.mxu2 %v1756_v56  ;;  %v1673_v56 = vpop.xlane.xlu1 %1672 }
 0xa3d   : > { %v1693_v7 = vpop.xlane.xlu0 %1692 }
 0xa3e   : > { %v1713_v8 = vsub.f32 %v3781_v35, %v1693_v7  ;;  %2285 = vperm.xlu0 %3010, %v2207_v33   ;;  %v2203_v35 = vld [vmem:[%s4105_s8 + $0x58] sm:$0xff] }
 0xa40   : > { %v1740_v42 = vmul.f32 1.442695, %v1713_v8  ;;  %v3124_v4 = vpop.eup %3123 }
 0xa42   : > { %3125 = vpow2.f32 %v1740_v42  ;;  %v2193_v42 = vld [vmem:[%s4105_s8 + $0x8] sm:$0xff] }
 0xa45   : > { %v1687_v54 = vpop.xlane.xlu0 %1686 }
 0xa46   : > { %2275 = vperm.xlu0 %3010, %v2205_v9   ;;  %v1710_v40 = vsub.f32 %v3764_v24, %v1687_v54 }
 0xa48   : > { %v3126_v36 = vpop.eup %3125  ;;  %v1734_v32 = vmul.f32 1.442695, %v1710_v40 }
 0xa49   : > { %v1755_v30 = vpack.c.bf16 %v3126_v36, %v3124_v4 }
 0xa4a   : > { %3127 = vpow2.f32 %v1734_v32 }
 0xa4b   : > { %1766 = vmatpush.bf16.xpose.msra.mxu1 %v1755_v30  ;;  %1780 = vmatpush.bf16.xpose.msra.mxu2 %v1755_v30 }
 0xa4d   : > { %v1689_v29 = vpop.xlane.xlu0 %1688 }
 0xa4e   : > { %v1711_v12 = vsub.f32 %v3768_v41, %v1689_v29  ;;  %2265 = vperm.xlu0 %3010, %v2203_v35   ;;  %v2199_v41 = vld [vmem:[%s4105_s8 + $0x38] sm:$0xff] }
 0xa4f   : > { %v2339_v29 = vld [vmem:[%s4107_s10 + $0x18] sm:$0xff] }
 0xa50   : > { %v1736_v13 = vmul.f32 1.442695, %v1711_v12  ;;  %v3128_v1 = vpop.eup %3127  ;;  %v3149_v12 = vld [vmem:[%s3406_s13 + $0x18] sm:$0xff] }
 0xa52   : > { %3129 = vpow2.f32 %v1736_v13  ;;  %v2886_v13 = vld [vmem:[%s3424_s30 + $0x38] sm:$0xff]  ;;  %s2870_s30 = sshll.u32 %s3235_s21, 4  ;;  %s2446_s21 = scalar_lea.sflag [#allocation4], %s3400_s11 }
 0xa53   : > { %s2456_s26 = sadd.s32 %s3231_s20, %s2870_s30 }
 0xa55   : > { %v1683_v24 = vpop.xlane.xlu0 %1682 }
 0xa56   : > { %2255 = vperm.xlu0 %3010, %v2201_v26   ;;  %v1708_v25 = vsub.f32 %v3753_v34, %v1683_v24  ;;  %v2197_v34 = vld [vmem:[%s4105_s8 + $0x28] sm:$0xff]  ;;  %v3150_v26 = vld [vmem:[%s3406_s13 + $0x10] sm:$0xff] }
 0xa57   : > { %v2342_v24 = vld [vmem:[%s4107_s10 + $0x30] sm:$0xff] }
 0xa58   : > { %v3130_v10 = vpop.eup %3129  ;;  %v1730_v23 = vmul.f32 1.442695, %v1708_v25  ;;  %v1558_v25 = vpop.f32.mrf.mxu2 }
 0xa59   : > { %v1754_v3 = vpack.c.bf16 %v3130_v10, %v3128_v1  ;;  %v3151_v1 = vld [vmem:[%s3406_s13 + $0x8] sm:$0xff]  ;;  %v3152_v10 = vld [vmem:[%s3406_s13] sm:$0xff]  ;;  %s2871_s13 = sshll.u32 %s2456_s26, 3 }
 0xa5a   : > { %3131 = vpow2.f32 %v1730_v23  ;;  %s2458_s17 = scalar_lea.hbm %s4128_s15, %s2871_s13  ;;  %s3173_s13 = scalar_lea.hbm %s4128_s15, 256 }
 0xa5b   : > { %1767 = vmatpush.bf16.xpose.msra.mxu1 %v1754_v3  ;;  %1781 = vmatpush.bf16.xpose.msra.mxu2 %v1754_v3  ;;  %s2461_s16 = sshll.u32 %s2458_s17, 4  ;;  %s2462_s16 = int_to_ptr.hbm [resolvable:$true] %s2461_s16 }
 0xa5c   : > { %s3167_s20 = sshra.s32 %s2462_s16, 4  ;;  %s3168_s20 = int_to_ptr.hbm [resolvable:$true] %s3167_s20 }
 0xa5d   : > { %v1685_v37 = vpop.xlane.xlu0 %1684  ;;  %s3169_s30 = scalar_lea.hbm %s3168_s20, 64  ;;  %p3174_p5 = scmp.lt.s32.totalorder %s3168_s20, %s4128_s15 }
 0xa5e   : > { %v1709_v22 = vsub.f32 %v3758_v38, %v1685_v37  ;;  %2245 = vperm.xlu0 %3010, %v2199_v41   ;;  %v1705_v38 = vsub.f32 %v3738_v15, %v1677_v43  ;;  %v1703_v15 = vsub.f32 %v3734_v28, %v1673_v56  ;;  %v2337_v28 = vld [vmem:[%s4107_s10 + $0x8] sm:$0xff]  ;;  %p3170_p2 = scmp.ne.s32.totalorder %s3168_s20, %s3169_s30  ;;  %p3175_p6 = scmp.lt.s32.totalorder %s3173_s13, %s3169_s30 }
 0xa5f   : > { %v2904_v43 = vld [vmem:[%s4101_s4 + $0x68] sm:$0xff] }
 0xa60   : > { %v1732_v49 = vmul.f32 1.442695, %v1709_v22  ;;  %v3132_v2 = vpop.eup %3131  ;;  %v1724_v5 = vmul.f32 1.442695, %v1705_v38  ;;  %v1720_v9 = vmul.f32 1.442695, %v1703_v15  ;;  %p3171_p3 = pnand %p3170_p2, %p3374_p8  ;;  %p3176_p7 = por %p3175_p6, %p3174_p5 }
 0xa62   : > { %3133 = vpow2.f32 %v1732_v49  ;;  %p3172_p4 = pneg %p3171_p3 }
 0xa63   : > { %3135 = vpow2.f32 %v1728_v45  ;;  %v2905_v45 = vld [vmem:[%s4101_s4 + $0x70] sm:$0xff] }
 0xa64   : > { %p3177_p10 = pnand %p3176_p7, %p3172_p4 }
 0xa65   : > { %v1679_v53 = vpop.xlane.xlu0 %1678 }
 0xa66   : > { %v1706_v62 = vsub.f32 %v3743_v63, %v1679_v53  ;;  %2235 = vperm.xlu0 %3010, %v2197_v34   ;;  %v2903_v34 = vld [vmem:[%s4101_s4 + $0x60] sm:$0xff]  ;;  %v2906_v53 = vld [vmem:[%s4101_s4 + $0x78] sm:$0xff] }
 0xa68   : > { %v3134_v52 = vpop.eup %3133  ;;  %v1726_v55 = vmul.f32 1.442695, %v1706_v62 }
 0xa69   : > { %v1753_v58 = vpack.c.bf16 %v3134_v52, %v3132_v2  ;;  %v3136_v33 = vpop.eup %3135  ;;  %v1920_v52 = vpop.permute.xlu1 %1919 }
 0xa6a   : > { %3137 = vpow2.f32 %v1726_v55 }
 0xa6b   : > { %1768 = vmatpush.bf16.xpose.msra.mxu1 %v1753_v58  ;;  %1782 = vmatpush.bf16.xpose.msra.mxu2 %v1753_v58  ;;  %3139 = vpow2.f32 %v1724_v5 }
 0xa6d   : > { %v1675_v44 = vpop.xlane.xlu0 %1674 }
 0xa6e   : > { %v1704_v63 = vsub.f32 %v3736_v14, %v1675_v44  ;;  %2225 = vperm.xlu0 %3010, %v2195_v20   ;;  %v1247_v44 = vadd.f32 %v3626_v46, %v3700_v51 }
 0xa70   : > { %v3138_v31 = vpop.eup %3137  ;;  %v1722_v7 = vmul.f32 1.442695, %v1704_v63  ;;  %v1562_v56 = vadd.f32 %v3745_v19, %v1247_v44 }
 0xa71   : > { %v1752_v8 = vpack.c.bf16 %v3136_v33, %v3138_v31  ;;  %v3140_v14 = vpop.eup %3139  ;;  %v1895_v38 = vpop.permute.xlu1 %1894 }
 0xa72   : > { %3141 = vpow2.f32 %v1722_v7 }
 0xa73   : > { %1769 = vmatpush.bf16.xpose.msra.mxu1 %v1752_v8  ;;  %1783 = vmatpush.bf16.xpose.msra.mxu2 %v1752_v8  ;;  %3143 = vpow2.f32 %v1720_v9 }
 0xa75   : > { %v1671_v54 = vpop.xlane.xlu0 %1670 }
 0xa76   : > { %v1702_v4 = vsub.f32 %v3732_v11, %v1671_v54  ;;  %2215 = vperm.xlu0 %3010, %v2193_v42   ;;  %v1252_v54 = vadd.f32 %v3632_v61, %v3702_v50 }
 0xa78   : > { %v3142_v36 = vpop.eup %3141  ;;  %v1718_v40 = vmul.f32 1.442695, %v1702_v4  ;;  %v1564_v4 = vadd.f32 %v3756_v59, %v1252_v54 }
 0xa79   : > { %v1751_v30 = vpack.c.bf16 %v3140_v14, %v3142_v36  ;;  %v3144_v35 = vpop.eup %3143  ;;  %v1885_v31 = vpop.permute.xlu1 %1884 }
 0xa7a   : > { %3145 = vpow2.f32 %v1718_v40 }
 0xa7b   : > { %1770 = vmatpush.bf16.xpose.msra.mxu1 %v1751_v30  ;;  %1784 = vmatpush.bf16.xpose.msra.mxu2 %v1751_v30  ;;  %v1257_v30 = vadd.f32 %v3640_v0, %v3704_v48  ;;  %v1262_v0 = vadd.f32 %v3651_v21, %v3706_v6  ;;  %v2915_v21 = vld [vmem:[%s4104_s7] sm:$0xff]  ;;  %v2910_v6 = vld [vmem:[%s4103_s6 + $0x18] sm:$0xff] }
 0xa7d   : > { %v1568_v48 = vadd.f32 %v1558_v25, %v1262_v0  ;;  %v2911_v25 = vld [vmem:[%s4103_s6 + $0x20] sm:$0xff] }
 0xa7e   : > { %2351 = vperm.xlu0 %3010, %v2337_v28   ;;  %v1566_v28 = vadd.f32 %v3766_v60, %v1257_v30 }
 0xa80   : > { %v3146_v32 = vpop.eup %3145 }
 0xa81   : > { %v1750_v11 = vpack.c.bf16 %v3144_v35, %v3146_v32 }
 0xa83   : > { %1771 = vmatpush.bf16.xpose.msra.mxu1 %v1750_v11  ;;  %1785 = vmatpush.bf16.xpose.msra.mxu2 %v1750_v11 }
 0xa86   : > { %2361 = vperm.xlu0 %3010, %v2339_v29   ;;  %v2908_v29 = vld [vmem:[%s4103_s6 + $0x8] sm:$0xff] }
 0xa88   : > { %v1915_v62 = vpop.permute.xlu0 %1914 }
 0xa8a   : > { %1772 = vmatmul.bf16.vlgmr.msra.gmra.mxu1 %v2886_v13  ;;  %1786 = vmatmul.bf16.vlgmr.msra.gmra.mxu2 %v3250_v16 }
 0xa8b   : > { %2147 = vmatpush.bf16.msrb.mxu1 %v3149_v12  ;;  %2930 = vmatpush.bf16.msrb.mxu2 %v3149_v12 }
 0xa8e   : > { %2376 = vperm.xlu0 %3010, %v2342_v24  }
 0xa8f   : > { %2148 = vmatpush.bf16.msrb.mxu1 %v3150_v26  ;;  %2931 = vmatpush.bf16.msrb.mxu2 %v3150_v26 }
 0xa90   : > { %v1905_v2 = vpop.permute.xlu0 %1904 }
 0xa93   : > { %2149 = vmatpush.bf16.msrb.mxu1 %v3151_v1  ;;  %2932 = vmatpush.bf16.msrb.mxu2 %v3151_v1 }
 0xa97   : > { %2150 = vmatpush.bf16.msrb.mxu1 %v3152_v10  ;;  %2933 = vmatpush.bf16.msrb.mxu2 %v3152_v10  ;;  %v2909_v10 = vld [vmem:[%s4103_s6 + $0x10] sm:$0xff] }
 0xa98   : > { %v1910_v55 = vpop.permute.xlu0 %1909 }
 0xa9a   : > { %2846 = vmatmul.msk.bf16.vlgmr.msrb.gmra.mxu2 %vm620_vm0, %v2908_v29 }
 0xaa0   : > { %v1900_v58 = vpop.permute.xlu0 %1899 }
 0xaa8   : > { %v1890_v7 = vpop.permute.xlu0 %1889 }
 0xaaa   : > { %2847 = vmatmul.msk.bf16.gmra.mxu2 %vm620_vm0, %v2909_v10 }
 0xaba   : > { %2848 = vmatmul.msk.bf16.gmra.mxu2 %vm620_vm0, %v2910_v6 }
 0xaca   : > { %2849 = vmatmul.msk.bf16.gmra.mxu2 %vm620_vm0, %v2911_v25 }
 0xb07   : > { %v1773_v3 = vpop.f32.mrf.mxu1 }
 0xb0d   : > { %v1787_v17 = vpop.f32.mrf.mxu2 }
 0xb0e   : > { %3147 = vrcp.f32 %v1787_v17  ;;  %v2912_v17 = vld [vmem:[%s4103_s6 + $0x28] sm:$0xff] }
 0xb0f   : > { %v1775_v22 = vpop.f32.mrf.mxu1  ;;  %2850 = vmatmul.msk.bf16.gmra.mxu2 %vm620_vm0, %v2912_v17 }
 0xb14   : > { %v3148_v41 = vpop.eup %3147 }
 0xb15   : > { %v1792_v23 = vperm.slane %v3148_v41, 0  ;;  %v1789_v37 = vpop.f32.mrf.mxu2  ;;  %v2918_v41 = vld [vmem:[%s4104_s7 + $0x18] sm:$0xff] }
 0xb16   : > { %v2919_v37 = vld [vmem:[%s4104_s7 + $0x20] sm:$0xff] }
 0xb17   : > { %v1793_v16 = vmul.f32 %v1792_v23, %v1773_v3  ;;  %v1794_v49 = vmul.f32 %v1792_v23, %v1775_v22  ;;  %v2917_v3 = vld [vmem:[%s4104_s7 + $0x10] sm:$0xff]  ;;  %v3982_v22 = vpop.permute.xlu1 %2280 }
 0xb18   : > { %v2913_v23 = vld [vmem:[%s4103_s6 + $0x30] sm:$0xff] }
 0xb19   : > { %v1795_v39 = vpack.c.bf16 %v1794_v49, %v1793_v16  ;;  %v3984_v16 = vpop.permute.xlu0 %2285  ;;  %v2914_v49 = vld [vmem:[%s4103_s6 + $0x38] sm:$0xff] }
 0xb1b   : > { %1844 = vmatpush.bf16.msra.mxu3 %v1795_v39 }
 0xb1d   : > { %v2157_v44 = vpop.f32.mrf.mxu2 }
 0xb1e   : > { %2769 = vmatmul.msk.bf16.vlgmr.msra.gmra.mxu3 %vm698_vm1, %v2903_v34 }
 0xb1f   : > { %2851 = vmatmul.msk.bf16.gmra.mxu2 %vm620_vm0, %v2913_v23  ;;  %v3991_v39 = vpop.permute.xlu1 %2270 }
 0xb21   : > { %v3993_v34 = vpop.permute.xlu0 %2275 }
 0xb2e   : > { %2770 = vmatmul.msk.bf16.gmra.mxu3 %vm698_vm1, %v2904_v43  ;;  %v2920_v43 = vld [vmem:[%s4104_s7 + $0x28] sm:$0xff] }
 0xb2f   : > { %2852 = vmatmul.msk.bf16.gmra.mxu2 %vm620_vm0, %v2914_v49 }
 0xb3e   : > { %2771 = vmatmul.msk.bf16.gmra.mxu3 %vm698_vm1, %v2905_v45  ;;  %v3999_v45 = vpop.permute.xlu1 %2260 }
 0xb4e   : > { %2772 = vmatmul.msk.bf16.gmra.mxu3 %vm698_vm1, %v2906_v53  ;;  %v4001_v53 = vpop.permute.xlu0 %2265 }
 0xba1   : > { %v1846_v20 = vpop.f32.mrf.mxu3 }
 0xba2   : > { %v1866_v5 = vadd.f32 %v1846_v20, %v3741_v18 }
 0xba4   : > { %v1922_v15 = vadd.f32 %v1885_v31, %v1866_v5 }
 0xba9   : > { %v1848_v63 = vpop.f32.mrf.mxu3 }
 0xbaa   : > { %v1867_v33 = vadd.f32 %v1848_v63, %v1562_v56 }
 0xbac   : > { %v1923_v8 = vadd.f32 %v1890_v7, %v1867_v33  ;;  %v2159_v7 = vpop.f32.mrf.mxu2 }
 0xbae   : > { %v1930_v42 = vpack.c.bf16 %v1923_v8, %v1922_v15 }
 0xbb1   : > { %v1851_v9 = vpop.f32.mrf.mxu3 }
 0xbb2   : > { %v1868_v18 = vadd.f32 %v1851_v9, %v3751_v27  ;;  %v2907_v27 = vld [vmem:[%s4103_s6] sm:$0xff] }
 0xbb3   : > { %2845 = vmatmul.msk.bf16.vlgmr.msrb.gmra.mxu1 %vm620_vm0, %v2907_v27 }
 0xbb4   : > { %v1924_v46 = vadd.f32 %v1895_v38, %v1868_v18 }
 0xbb9   : > { %v1853_v14 = vpop.f32.mrf.mxu3 }
 0xbba   : > { %v1869_v36 = vadd.f32 %v1853_v14, %v1564_v4  ;;  %v2162_v14 = vpop.f32.mrf.mxu2 }
 0xbbc   : > { %v1925_v51 = vadd.f32 %v1900_v58, %v1869_v36  ;;  %v2922_v58 = vld [vmem:[%s4104_s7 + $0x38] sm:$0xff] }
 0xbbe   : > { %v1931_v19 = vpack.c.bf16 %v1925_v51, %v1924_v46 }
 0xbc1   : > { %v1856_v40 = vpop.f32.mrf.mxu3 }
 0xbc2   : > { %v1870_v35 = vadd.f32 %v1856_v40, %v3762_v47 }
 0xbc4   : > { %v1926_v61 = vadd.f32 %v1905_v2, %v1870_v35  ;;  %v4006_v2 = vpop.permute.xlu1 %2250 }
 0xbc9   : > { %v1858_v32 = vpop.f32.mrf.mxu3 }
 0xbca   : > { %v1871_v11 = vadd.f32 %v1858_v32, %v1566_v28  ;;  %v2164_v28 = vpop.f32.mrf.mxu2 }
 0xbcc   : > { %v1927_v50 = vadd.f32 %v1910_v55, %v1871_v11  ;;  %v2241_v55 = vpop.permute.xlu1 %2240 }
 0xbce   : > { %v1932_v59 = vpack.c.bf16 %v1927_v50, %v1926_v61 }
 0xbd1   : > { %v1861_v12 = vpop.f32.mrf.mxu3 }
 0xbd2   : > { %v1872_v47 = vadd.f32 %v1861_v12, %v3771_v57  ;;  %v2916_v57 = vld [vmem:[%s4104_s7 + $0x8] sm:$0xff]  ;;  %v2167_v27 = vpop.f32.mrf.mxu2 }
 0xbd4   : > { %v1928_v26 = vadd.f32 %v1915_v62, %v1872_v47  ;;  %v2921_v62 = vld [vmem:[%s4104_s7 + $0x30] sm:$0xff]  ;;  %v2231_v20 = vpop.permute.xlu1 %2230 }
 0xbd9   : > { %v1863_v60 = vpop.f32.mrf.mxu3 }
 0xbda   : > { %v1873_v13 = vadd.f32 %v1863_v60, %v1568_v48  ;;  %v2169_v47 = vpop.f32.mrf.mxu2 }
 0xbdc   : > { %v1929_v24 = vadd.f32 %v1920_v52, %v1873_v13  ;;  %v4008_v52 = vpop.permute.xlu0 %2255  ;;  %v2221_v63 = vpop.permute.xlu1 %2220 }
 0xbde   : > { %v1933_v1 = vpack.c.bf16 %v1929_v24, %v1928_v26 }
 0xbe0   : > { %2034 = vmatpush.bf16.msrb.mxu0 %v1933_v1 }
 0xbe4   : > { %2035 = vmatpush.bf16.msrb.mxu0 %v1932_v59  ;;  %v2246_v38 = vpop.permute.xlu0 %2245 }
 0xbe8   : > { %2036 = vmatpush.bf16.msrb.mxu0 %v1931_v19 }
 0xbec   : > { %2037 = vmatpush.bf16.msrb.mxu0 %v1930_v42  ;;  %v2236_v5 = vpop.permute.xlu0 %2235  ;;  %v2211_v42 = vpop.permute.xlu1 %2210 }
 0xbef   : > { %2805 = vmatmul.msk.bf16.vlgmr.msrb.gmra.mxu0 %vm620_vm0, %v2915_v21 }
 0xbf4   : > { %v2226_v33 = vpop.permute.xlu0 %2225 }
 0xbfc   : > { %v2216_v18 = vpop.permute.xlu0 %2215 }
 0xbff   : > { %2806 = vmatmul.msk.bf16.gmra.mxu0 %vm620_vm0, %v2916_v57  ;;  %v2172_v57 = vpop.f32.mrf.mxu2 }
 0xc07   : > { %v2174_v23 = vpop.f32.mrf.mxu2 }
 0xc0f   : > { %2807 = vmatmul.msk.bf16.gmra.mxu0 %vm620_vm0, %v2917_v3 }
 0xc1f   : > { %2808 = vmatmul.msk.bf16.gmra.mxu0 %vm620_vm0, %v2918_v41 }
 0xc2f   : > { %2809 = vmatmul.msk.bf16.gmra.mxu0 %vm620_vm0, %v2919_v37 }
 0xc30   : > { %v2152_v56 = vpop.f32.mrf.mxu1 }
 0xc38   : > { %v2154_v8 = vpop.f32.mrf.mxu1 }
 0xc3f   : > { %2810 = vmatmul.msk.bf16.gmra.mxu0 %vm620_vm0, %v2920_v43 }
 0xc4f   : > { %2811 = vmatmul.msk.bf16.gmra.mxu0 %vm620_vm0, %v2921_v62 }
 0xc5f   : > { %2812 = vmatmul.msk.bf16.gmra.mxu0 %vm620_vm0, %v2922_v58 }
 0xc6c   : > { %v2039_v31 = vpop.f32.mrf.mxu0 }
 0xc6d   : > { %v2153_v15 = vadd.f32 %v2152_v56, %v2039_v31 }
 0xc6f   : > { %v2288_v54 = vadd.f32 %v2211_v42, %v2153_v15 }
 0xc71   : > { %v2304_v46 = vmax.f32 %v2288_v54, 0.0 }
 0xc74   : > { %v2041_v9 = vpop.f32.mrf.mxu0 }
 0xc75   : > { %v2155_v4 = vadd.f32 %v2154_v8, %v2041_v9 }
 0xc77   : > { %v2289_v36 = vadd.f32 %v2216_v18, %v2155_v4 }
 0xc79   : > { %v2305_v51 = vmax.f32 %v2289_v36, 0.0 }
 0xc7b   : > { %v4015_v19 = vpack.c.bf16 %v2305_v51, %v2304_v46 }
 0xc7c   : > { %v2044_v40 = vpop.f32.mrf.mxu0 }
 0xc7d   : > { %v2158_v30 = vadd.f32 %v2157_v44, %v2044_v40  ;;  %v2177_v44 = vpop.f32.mrf.mxu2 }
 0xc7f   : > { %v2290_v32 = vadd.f32 %v2221_v63, %v2158_v30 }
 0xc81   : > { %v2306_v50 = vmax.f32 %v2290_v32, 0.0 }
 0xc84   : > { %v2046_v35 = vpop.f32.mrf.mxu0 }
 0xc85   : > { %v2160_v11 = vadd.f32 %v2159_v7, %v2046_v35 }
 0xc87   : > { %v2291_v61 = vadd.f32 %v2226_v33, %v2160_v11 }
 0xc89   : > { %v2307_v59 = vmax.f32 %v2291_v61, 0.0 }
 0xc8b   : > { %v4017_v29 = vpack.c.bf16 %v2307_v59, %v2306_v50 }
 0xc8c   : > { %v2049_v12 = vpop.f32.mrf.mxu0 }
 0xc8d   : > { %v2163_v0 = vadd.f32 %v2162_v14, %v2049_v12 }
 0xc8f   : > { %v2292_v60 = vadd.f32 %v2231_v20, %v2163_v0 }
 0xc91   : > { %v2308_v24 = vmax.f32 %v2292_v60, 0.0  ;;  %v2347_v60 = vpop.permute.xlu1 %2346 }
 0xc94   : > { %v2051_v48 = vpop.f32.mrf.mxu0 }
 0xc95   : > { %v2165_v13 = vadd.f32 %v2164_v28, %v2051_v48 }
 0xc97   : > { %v2293_v26 = vadd.f32 %v2236_v5, %v2165_v13  ;;  %v2179_v5 = vpop.f32.mrf.mxu2 }
 0xc99   : > { %v2309_v1 = vmax.f32 %v2293_v26, 0.0  ;;  %v2352_v26 = vpop.permute.xlu0 %2351 }
 0xc9b   : > { %v2322_v10 = vpack.c.bf16 %v2309_v1, %v2308_v24 }
 0xc9c   : > { %v2054_v21 = vpop.f32.mrf.mxu0 }
 0xc9d   : > { %v2168_v6 = vadd.f32 %v2167_v27, %v2054_v21 }
 0xc9f   : > { %v2294_v3 = vadd.f32 %v2241_v55, %v2168_v6  ;;  %v2182_v33 = vpop.f32.mrf.mxu2 }
 0xca1   : > { %v2310_v37 = vmax.f32 %v2294_v3, 0.0 }
 0xca4   : > { %v2056_v25 = vpop.f32.mrf.mxu0 }
 0xca5   : > { %v2170_v17 = vadd.f32 %v2169_v47, %v2056_v25 }
 0xca7   : > { %v2295_v41 = vadd.f32 %v2246_v38, %v2170_v17  ;;  %v2184_v7 = vpop.f32.mrf.mxu2 }
 0xca9   : > { %v2311_v49 = vmax.f32 %v2295_v41, 0.0 }
 0xcab   : > { %v2323_v43 = vpack.c.bf16 %v2311_v49, %v2310_v37  ;;  %v2372_v37 = vpop.permute.xlu2 %2371 }
 0xcac   : > { %v2059_v62 = vpop.f32.mrf.mxu0 }
 0xcad   : > { %v2173_v58 = vadd.f32 %v2172_v57, %v2059_v62  ;;  %v2362_v57 = vpop.permute.xlu0 %2361 }
 0xcaf   : > { %v2187_v8 = vpop.f32.mrf.mxu2 }
 0xcb4   : > { %v2061_v20 = vpop.f32.mrf.mxu0 }
 0xcb5   : > { %v2175_v32 = vadd.f32 %v2174_v23, %v2061_v20  ;;  %v2377_v62 = vpop.permute.xlu0 %2376 }
 0xcb7   : > { %v2189_v54 = vpop.f32.mrf.mxu2 }
 0xcbc   : > { %v2064_v56 = vpop.f32.mrf.mxu0 }
 0xcbd   : > { %v2178_v40 = vadd.f32 %v2177_v44, %v2064_v56 }
 0xcbf   : > { %v2298_v59 = vadd.f32 %v3999_v45, %v2178_v40  ;;  %v2923_v45 = vld [vmem:[%s4106_s9] sm:$0xff] }
 0xcc1   : > { %v2314_v0 = vmax.f32 %v2298_v59, 0.0 }
 0xcc4   : > { %v2066_v63 = vpop.f32.mrf.mxu0 }
 0xcc5   : > { %v2180_v36 = vadd.f32 %v2179_v5, %v2066_v63 }
 0xcc7   : > { %v2299_v11 = vadd.f32 %v4001_v53, %v2180_v36 }
 0xcc9   : > { %v2315_v12 = vmax.f32 %v2299_v11, 0.0 }
 0xccb   : > { %v2325_v48 = vpack.c.bf16 %v2315_v12, %v2314_v0 }
 0xccc   : > { %v2069_v31 = vpop.f32.mrf.mxu0 }
 0xccd   : > { %v2183_v4 = vadd.f32 %v2182_v33, %v2069_v31 }
 0xccf   : > { %v2300_v30 = vadd.f32 %v3991_v39, %v2183_v4 }
 0xcd1   : > { %v2316_v27 = vmax.f32 %v2300_v30, 0.0 }
 0xcd4   : > { %v2071_v15 = vpop.f32.mrf.mxu0 }
 0xcd5   : > { %v2185_v9 = vadd.f32 %v2184_v7, %v2071_v15 }
 0xcd7   : > { %v2301_v46 = vadd.f32 %v3993_v34, %v2185_v9 }
 0xcd9   : > { %v2317_v61 = vmax.f32 %v2301_v46, 0.0 }
 0xcdb   : > { %v2326_v34 = vpack.c.bf16 %v2317_v61, %v2316_v27 }
 0xcdc   : > { %v2074_v42 = vpop.f32.mrf.mxu0 }
 0xcdd   : > { %v2188_v55 = vadd.f32 %v2187_v8, %v2074_v42 }
 0xcdf   : > { %v2302_v18 = vadd.f32 %v3982_v22, %v2188_v55  ;;  %v2297_v22 = vadd.f32 %v4008_v52, %v2175_v32  ;;  %v2925_v52 = vld [vmem:[%s4106_s9 + $0x10] sm:$0xff] }
 0xce1   : > { %v2318_v28 = vmax.f32 %v2302_v18, 0.0  ;;  %v2313_v39 = vmax.f32 %v2297_v22, 0.0 }
 0xce4   : > { %v2076_v38 = vpop.f32.mrf.mxu0 }
 0xce5   : > { %v2190_v14 = vadd.f32 %v2189_v54, %v2076_v38 }
 0xce7   : > { %v2303_v51 = vadd.f32 %v3984_v16, %v2190_v14  ;;  %v2296_v16 = vadd.f32 %v4006_v2, %v2173_v58  ;;  %v2924_v2 = vld [vmem:[%s4106_s9 + $0x8] sm:$0xff] }
 0xce9   : > { %v2319_v35 = vmax.f32 %v2303_v51, 0.0  ;;  %v2312_v47 = vmax.f32 %v2296_v16, 0.0 }
 0xceb   : > { %v2327_v50 = vpack.c.bf16 %v2319_v35, %v2318_v28  ;;  %v2324_v53 = vpack.c.bf16 %v2313_v39, %v2312_v47 }
 0xced   : > { %2408 = vmatpush.bf16.msrb.mxu3 %v2327_v50 }
 0xcf1   : > { %2409 = vmatpush.bf16.msrb.mxu3 %v2326_v34 }
 0xcf5   : > { %2410 = vmatpush.bf16.msrb.mxu3 %v2325_v48 }
 0xcf9   : > { %2411 = vmatpush.bf16.msrb.mxu3 %v2324_v53 }
 0xcfd   : > { %2412 = vmatpush.bf16.msrb.mxu3 %v2323_v43 }
 0xd01   : > { %2413 = vmatpush.bf16.msrb.mxu3 %v2322_v10  ;;  %v2357_v10 = vpop.permute.xlu1 %2356 }
 0xd05   : > { %2414 = vmatpush.bf16.msrb.mxu3 %v4017_v29  ;;  %v2926_v29 = vld [vmem:[%s4106_s9 + $0x18] sm:$0xff] }
 0xd09   : > { %2415 = vmatpush.bf16.msrb.mxu3 %v4015_v19  ;;  %v2367_v17 = vpop.permute.xlu1 %2366 }
 0xd0c   : > { %2416 = vmatmul.bf16.vlgmr.msrb.gmra.mxu3 %v2923_v45 }
 0xd11   : > { %v2382_v20 = vpop.permute.xlu1 %2381 }
 0xd1c   : > { %2421 = vmatmul.bf16.gmra.mxu3 %v2924_v2 }
 0xd2c   : > { %2426 = vmatmul.bf16.gmra.mxu3 %v2925_v52 }
 0xd3c   : > { %2431 = vmatmul.bf16.gmra.mxu3 %v2926_v29 }
 0xd8f   : > { %v2417_v13 = vpop.f32.mrf.mxu3 }
 0xd90   : > { %v2418_v19 = vadd.f32 %v2417_v13, %v2347_v60 }
 0xd92   : > { %2437 = vst [vmem:[%s4042_s25] sm:$0xff] %v2418_v19 }
 0xd97   : > { %v2419_v24 = vpop.f32.mrf.mxu3 }
 0xd98   : > { %v2420_v1 = vadd.f32 %v2419_v24, %v2352_v26 }
 0xd9a   : > { %2438 = vst [vmem:[%s4042_s25 + $0x8] sm:$0xff] %v2420_v1 }
 0xd9f   : > { %v2422_v21 = vpop.f32.mrf.mxu3 }
 0xda0   : > { %v2423_v6 = vadd.f32 %v2422_v21, %v2357_v10 }
 0xda2   : > { %2439 = vst [vmem:[%s4042_s25 + $0x10] sm:$0xff] %v2423_v6 }
 0xda7   : > { %v2424_v25 = vpop.f32.mrf.mxu3 }
 0xda8   : > { %v2425_v3 = vadd.f32 %v2424_v25, %v2362_v57 }
 0xdaa   : > { %2440 = vst [vmem:[%s4042_s25 + $0x18] sm:$0xff] %v2425_v3 }
 0xdaf   : > { %v2427_v41 = vpop.f32.mrf.mxu3 }
 0xdb0   : > { %v2428_v23 = vadd.f32 %v2427_v41, %v2367_v17 }
 0xdb2   : > { %2441 = vst [vmem:[%s4042_s25 + $0x20] sm:$0xff] %v2428_v23 }
 0xdb7   : > { %v2429_v49 = vpop.f32.mrf.mxu3 }
 0xdb8   : > { %v2430_v43 = vadd.f32 %v2429_v49, %v2372_v37 }
 0xdba   : > { %2442 = vst [vmem:[%s4042_s25 + $0x28] sm:$0xff] %v2430_v43 }
 0xdbf   : > { %v2432_v58 = vpop.f32.mrf.mxu3 }
 0xdc0   : > { %v2433_v44 = vadd.f32 %v2432_v58, %v2377_v62 }
 0xdc2   : > { %2443 = vst [vmem:[%s4042_s25 + $0x30] sm:$0xff] %v2433_v44 }
 0xdc7   : > { %v2434_v56 = vpop.f32.mrf.mxu3 }
 0xdc8   : > { %v2435_v5 = vadd.f32 %v2434_v56, %v2382_v20 }
 0xdca   : > { %2444 = vst [vmem:[%s4042_s25 + $0x38] sm:$0xff] %v2435_v5 }
 0xdcb   : > { %3180 = shalt.err (!%p3177_p10)
}
 0xdcc   : > { %s3251_s11 = smov 128   ;;  %s3252_s25 = smov 256  }
 0xdcd   : > { %s3253_s17 = smov 8  }
 0xdce   : > { %2934 = dma.vmem_to_hbm [thread:$0]  (%p3374_p8), %s2460_s28, 1024, %s2462_s16, %s2446_s21, %s3251_s11, %s3252_s25, %s3253_s17  }
 0xdcf PF: > { %s4129_s1 = sld [smem:[#allocation6_spill]]  ;;  %p2940_p11 = scmp.ge.s32.totalorder %s3247_s24, 2 }
 0xdd1   : > { %p2937_p12 = pnand %p2940_p11, %p3378_p9 }
 0xdd3   : > { %p2938_p13 = pneg %p2937_p12 }
 0xdd5   : > { %s2476_s0 = sand.u32 1, %s4129_s1  }
 0xdd6   : > { %s2477_s20 = scalar_lea.sflag [#allocation4], %s2476_s0 }
 0xdd7   : > { %3214 = dma.done.wait (%p2938_p13), %s2477_s20, 1024  }
 0xdd8   : > { %3216 = vsyncadd (%p2938_p13), %s2477_s20, 4294966272  ;;  %s24_s24 = sadd.s32 1, %s3247_s24   ;;  %s4131_s12 = sld [smem:[#allocation7_spill]] }
 0xdd9   : > { %p21_p0 = scmp.ge.s32.totalorder %s24_s24, 6   ;;  %s4132_s28 = sld [smem:[#allocation8_spill]] }
 0xdda   : > { %s4133_s17 = smov %s3223_s18  ;;  %s4134_s18 = smov %s3227_s19 }
 0xddb   : > { %s4135_s19 = smov %s3386_s27  ;;  %s4136_s20 = smov %s3239_s22 }
 0xddc   : > { %s4137_s21 = smov %s3243_s23  ;;  %23 = sbr.rel (!%p21_p0) target bundleno = 10 (0xa), region = 151 }
 0xdde   : > { %s4138_s22 = smov %s4131_s12 }
 0xddf   : > { %s4139_s23 = smov %s4132_s28 }
 0xde1   :  { %2483 = vsyncpa [#allocation4], 1 }
 0xde2   :  { %2485 = vsyncpa [#allocation4 + $0x1], 1 }

</bundles_post_ra>
